<compile_context>
chip_gen: v7x
topology: tpu7x:2x2x1
jax: 0.10.0
libtpu: 0.0.40
codegen_flags: <defaults>
</compile_context>

<pallas_src>
import functools
import numpy as np

import jax
import jax.numpy as jnp
from jax.experimental import pallas as pl
from jax.experimental.pallas import tpu as pltpu


# ----------------------------------------------------------------------------
# Small helpers
# ----------------------------------------------------------------------------
def _full_spec(shape):
    """BlockSpec covering the whole array (for rank-1 grids)."""
    nd = len(shape)
    return pl.BlockSpec(shape, lambda i, _nd=nd: (0,) * _nd)


def _bytes(args, extra=0):
    return int(sum(int(a.size) * a.dtype.itemsize for a in args) + extra)


# ----------------------------------------------------------------------------
# Fused Pallas kernels
# ----------------------------------------------------------------------------
def _gnn_encoder_kernel(x_ref, ea_ref, src_ref, dst_ref, *refs, num_layers):
    """Whole GNNEncoder (num_layers x NodeEdgeInteraction_node + eval BatchNorm).

    One-hot gather matrices are built once from iota compares and reused for
    every layer; the scatter-sum is a TN matmul on the dst one-hot."""
    o_ref = refs[-1]
    w = refs[:-1]                                   # 10 refs per layer

    x = x_ref[...]                                  # (N, Cin_node)   f32
    ea = ea_ref[...]                                # (E, Cin_edge)   f32
    N = x.shape[0]
    E = ea.shape[0]

    # (E, N) one-hot gather matrices — 0/1 values are exact in bf16.
    col_ids = jax.lax.broadcasted_iota(jnp.int32, (E, N), 1)
    g_src = (col_ids == src_ref[...]).astype(jnp.bfloat16)       # src: (E,1)
    g_dst = (col_ids == dst_ref[...]).astype(jnp.bfloat16)       # dst: (E,1)

    for l in range(num_layers):
        (node_w, edge_w, fn_wa, fn_wb, fn_b,
         fe_wa, fe_wb, fe_b, bn_s, bn_sh) = (r[...] for r in w[10 * l:10 * (l + 1)])

        # node_lin / edge_lin (bias=False) + ReLU
        n1 = jnp.maximum(jnp.dot(x.astype(jnp.bfloat16), node_w,
                                 preferred_element_type=jnp.float32), 0.0)   # (N, Ch)
        e1 = jnp.maximum(jnp.dot(ea.astype(jnp.bfloat16), edge_w,
                                 preferred_element_type=jnp.float32), 0.0)   # (E, Ch)
        n1b = n1.astype(jnp.bfloat16)
        e1b = e1.astype(jnp.bfloat16)

        # Gather n1[src], n1[dst] on the MXU
        n1_src = jnp.dot(g_src, n1b, preferred_element_type=jnp.float32)     # (E, Ch)
        n1_dst = jnp.dot(g_dst, n1b, preferred_element_type=jnp.float32)     # (E, Ch)

        # Scatter-sum of e1 at dst nodes (aggr='sum'): g_dst^T @ e1 (TN matmul)
        aggr = jax.lax.dot_general(g_dst, e1b, (((0,), (0,)), ((), ())),
                                   preferred_element_type=jnp.float32)       # (N, Ch)

        # update(): relu(final_node_lin(cat([aggr, n1]))) with split weight,
        # then eval-mode BatchNorm folded as per-channel scale+shift.
        n2 = (jnp.dot(aggr.astype(jnp.bfloat16), fn_wa,
                      preferred_element_type=jnp.float32)
              + jnp.dot(n1b, fn_wb, preferred_element_type=jnp.float32)
              + fn_b)
        n2 = jnp.maximum(n2, 0.0)
        x = n2 * bn_s + bn_sh                                                # (N, Cout)

        # edge_updater(): relu(final_edge_lin(cat([n1[src]+n1[dst], e1])))
        e2 = (jnp.dot((n1_src + n1_dst).astype(jnp.bfloat16), fe_wa,
                      preferred_element_type=jnp.float32)
              + jnp.dot(e1b, fe_wb, preferred_element_type=jnp.float32)
              + fe_b)
        ea = jnp.maximum(e2, 0.0)                                            # (E, Cout)

    o_ref[...] = x


def _cross_attn_kernel(a_ref, b_ref,
                       wq_ref, bq_ref, wk_ref, bk_ref, wv_ref, bv_ref,
                       wo_ref, bo_ref, lng_ref, lnb_ref,
                       o_ref, *, scale, eps):
    """Single-head MHA(query=A, key=B, value=B) + LayerNorm for ONE graph.

    The batch axis is a 'parallel' grid dimension, so no block-diagonal mask is
    needed and per-graph softmax is exact."""
    a = a_ref[0].astype(jnp.bfloat16)                       # (Nn, D)
    b = b_ref[0].astype(jnp.bfloat16)

    q = jnp.dot(a, wq_ref[...], preferred_element_type=jnp.float32) + bq_ref[...]
    k = jnp.dot(b, wk_ref[...], preferred_element_type=jnp.float32) + bk_ref[...]
    v = jnp.dot(b, wv_ref[...], preferred_element_type=jnp.float32) + bv_ref[...]

    s = jax.lax.dot_general(q.astype(jnp.bfloat16), k.astype(jnp.bfloat16),
                            (((1,), (1,)), ((), ())),
                            preferred_element_type=jnp.float32) * scale      # (Nn, Nn)

    m = jnp.max(s, axis=-1, keepdims=True)
    p = jnp.exp(s - m)
    denom = jnp.sum(p, axis=-1, keepdims=True)
    attn = jnp.dot(p.astype(jnp.bfloat16), v.astype(jnp.bfloat16),
                   preferred_element_type=jnp.float32) \
        * pl.reciprocal(denom, approx=True)

    out = jnp.dot(attn.astype(jnp.bfloat16), wo_ref[...],
                  preferred_element_type=jnp.float32) + bo_ref[...]

    # LayerNorm over the embedding dim (f32)
    mu = jnp.mean(out, axis=-1, keepdims=True)
    xc = out - mu
    var = jnp.mean(xc * xc, axis=-1, keepdims=True)
    o_ref[0, :, :] = xc * jax.lax.rsqrt(var + eps) * lng_ref[...] + lnb_ref[...]


def _edge_decoder_kernel(z_ref, e0_ref, e1_ref, *refs, num_layers, apply_sigmoid):
    """Fused EdgeDecoder for one edge tile: z[e0]*z[e1] gather/hadamard + MLP.

    Last MLP layer is zero-padded to a 128-wide lane-dense output; the wrapper
    slices column 0 back out."""
    o_ref = refs[-1]
    wb = refs[:-1]

    z = z_ref[...]                                          # (N, 2D) f32 (exact gather)
    N = z.shape[0]
    Et = e0_ref.shape[0]

    col_ids = jax.lax.broadcasted_iota(jnp.int32, (Et, N), 1)
    g0 = (col_ids == e0_ref[...]).astype(jnp.float32)
    g1 = (col_ids == e1_ref[...]).astype(jnp.float32)
    h = (jnp.dot(g0, z, preferred_element_type=jnp.float32)
         * jnp.dot(g1, z, preferred_element_type=jnp.float32))

    for i in range(num_layers):
        w = wb[2 * i][...]                                  # bf16
        bias = wb[2 * i + 1][...]                           # f32
        h = jnp.dot(h.astype(jnp.bfloat16), w,
                    preferred_element_type=jnp.float32) + bias
        if i < num_layers - 1:
            h = jnp.maximum(h, 0.0)
    if apply_sigmoid:
        h = jax.nn.sigmoid(h)
    o_ref[...] = h


# ----------------------------------------------------------------------------
# Pallas wrappers (one pallas_call per fused module)
# ----------------------------------------------------------------------------
def gnn_encoder_pallas(x, edge_attr, src, dst, enc_params):
    """Whole GNNEncoder in one fused pallas_call: (x, edge_index, edge_attr) -> z."""
    x = x.astype(jnp.float32)
    edge_attr = edge_attr.astype(jnp.float32)
    N = x.shape[0]
    E = edge_attr.shape[0]

    src_col = src.reshape(E, 1).astype(jnp.int32)
    dst_col = dst.reshape(E, 1).astype(jnp.int32)

    args = [x, edge_attr, src_col, dst_col]
    flops = 0
    num_layers = len(enc_params["convs"])
    for p, bn in zip(enc_params["convs"], enc_params["bns"]):
        Cin_n, Ch = p["node_w"].shape
        Cin_e = p["edge_w"].shape[0]
        Cout = p["fn_w"].shape[1]
        fn_wa = p["fn_w"][:Ch].astype(jnp.bfloat16)
        fn_wb = p["fn_w"][Ch:].astype(jnp.bfloat16)
        fe_wa = p["fe_w"][:Ch].astype(jnp.bfloat16)
        fe_wb = p["fe_w"][Ch:].astype(jnp.bfloat16)
        bn_scale = (bn["gamma"] * jax.lax.rsqrt(bn["var"] + bn["eps"])).reshape(1, Cout)
        bn_shift = (bn["beta"] - bn["mean"] * bn_scale[0]).reshape(1, Cout)
        args += [p["node_w"].astype(jnp.bfloat16), p["edge_w"].astype(jnp.bfloat16),
                 fn_wa, fn_wb, p["fn_b"].reshape(1, Cout).astype(jnp.float32),
                 fe_wa, fe_wb, p["fe_b"].reshape(1, Cout).astype(jnp.float32),
                 bn_scale.astype(jnp.float32), bn_shift.astype(jnp.float32)]
        flops += 2 * (N * Cin_n * Ch + E * Cin_e * Ch + 3 * E * N * Ch
                      + 2 * N * Ch * Cout + 2 * E * Ch * Cout)

    Cout_final = enc_params["convs"][-1]["fn_w"].shape[1]

    # TODO(synk): for realistic graph sizes, tile E with a parallel grid axis and
    # replace the dense one-hot gathers with a scalar-prefetched index path.
    return pl.pallas_call(
        functools.partial(_gnn_encoder_kernel, num_layers=num_layers),
        out_shape=jax.ShapeDtypeStruct((N, Cout_final), jnp.float32),
        grid=(1,),
        in_specs=[_full_spec(a.shape) for a in args],
        out_specs=_full_spec((N, Cout_final)),
        compiler_params=pltpu.CompilerParams(dimension_semantics=("arbitrary",)),
        cost_estimate=pl.CostEstimate(flops=int(flops), transcendentals=0,
                                      bytes_accessed=_bytes(args, 4 * N * Cout_final)),
    )(*args)


def cross_attention_pallas(mod_a, mod_b, p):
    """CrossAttention.forward, gridded per graph: output (B, Nn, D)."""
    B, Nn, D = mod_a.shape
    a = mod_a.astype(jnp.float32)
    b = mod_b.astype(jnp.float32)

    weights = (p["wq"].astype(jnp.bfloat16), p["bq"].reshape(1, D),
               p["wk"].astype(jnp.bfloat16), p["bk"].reshape(1, D),
               p["wv"].astype(jnp.bfloat16), p["bv"].reshape(1, D),
               p["wo"].astype(jnp.bfloat16), p["bo"].reshape(1, D),
               p["ln_g"].reshape(1, D), p["ln_b"].reshape(1, D))
    args = (a, b) + weights

    in_specs = [pl.BlockSpec((1, Nn, D), lambda i: (i, 0, 0)),
                pl.BlockSpec((1, Nn, D), lambda i: (i, 0, 0))] + \
               [_full_spec(w.shape) for w in weights]

    flops = 2 * B * (4 * Nn * D * D + 2 * Nn * Nn * D)
    out = pl.pallas_call(
        functools.partial(_cross_attn_kernel, scale=1.0 / float(np.sqrt(D)), eps=1e-5),
        out_shape=jax.ShapeDtypeStruct((B, Nn, D), jnp.float32),
        grid=(B,),
        in_specs=in_specs,
        out_specs=pl.BlockSpec((1, Nn, D), lambda i: (i, 0, 0)),
        compiler_params=pltpu.CompilerParams(dimension_semantics=("parallel",)),
        cost_estimate=pl.CostEstimate(flops=int(flops), transcendentals=int(B * Nn * Nn),
                                      bytes_accessed=_bytes(args, 4 * B * Nn * D)),
    )(*args)
    return out


def edge_decoder_pallas(z, edges, p, sigmoid=False, tile_e=16):
    """EdgeDecoder.forward (eval mode) as one fused, edge-tiled pallas_call."""
    z = z.astype(jnp.float32)
    N, C = z.shape
    Ed = edges.shape[1]
    Ed_pad = max(tile_e, ((Ed + tile_e - 1) // tile_e) * tile_e)
    pad = Ed_pad - Ed
    e0 = jnp.pad(edges[0].astype(jnp.int32), (0, pad)).reshape(Ed_pad, 1)
    e1 = jnp.pad(edges[1].astype(jnp.int32), (0, pad)).reshape(Ed_pad, 1)

    num_layers = len(p["ws"])
    OUT_PAD = 128
    wb = []
    for li, (w, b) in enumerate(zip(p["ws"], p["bs"])):
        if li == num_layers - 1:                      # lane-dense padded last layer
            w = jnp.pad(w, ((0, 0), (0, OUT_PAD - w.shape[1])))
            b = jnp.pad(b, (0, OUT_PAD - b.shape[0]))
        wb.append(w.astype(jnp.bfloat16))
        wb.append(b.reshape(1, -1).astype(jnp.float32))
    args = (z, e0, e1, *wb)

    in_specs = [_full_spec(z.shape),
                pl.BlockSpec((tile_e, 1), lambda i: (i, 0)),
                pl.BlockSpec((tile_e, 1), lambda i: (i, 0))] + \
               [_full_spec(a.shape) for a in wb]

    flops = 2 * Ed_pad * (2 * N * C + sum(int(w.shape[0] * w.shape[1]) for w in p["ws"]))
    out = pl.pallas_call(
        functools.partial(_edge_decoder_kernel, num_layers=num_layers,
                          apply_sigmoid=sigmoid),
        out_shape=jax.ShapeDtypeStruct((Ed_pad, OUT_PAD), jnp.float32),
        grid=(Ed_pad // tile_e,),
        in_specs=in_specs,
        out_specs=pl.BlockSpec((tile_e, OUT_PAD), lambda i: (i, 0)),
        compiler_params=pltpu.CompilerParams(dimension_semantics=("parallel",)),
        cost_estimate=pl.CostEstimate(flops=int(flops),
                                      transcendentals=int(Ed_pad if sigmoid else 0),
                                      bytes_accessed=_bytes(args, 4 * Ed_pad * OUT_PAD)),
    )(*args)
    return out[:Ed, :1]


def decode_edges_merged(z, masked_edges, neg_edges, p, sigmoid=False):
    """One fused decoder call for masked+negative edges of a modality."""
    n_pos = masked_edges.shape[1]
    n_neg = neg_edges.shape[1]
    edges = jnp.concatenate([masked_edges, neg_edges], axis=1)
    out = edge_decoder_pallas(z, edges, p, sigmoid)
    return out[:n_pos], out[n_pos:n_pos + n_neg]


# ----------------------------------------------------------------------------
# Model forward (thin glue around the fused kernels)
# ----------------------------------------------------------------------------
def maskgae_stage1_forward(params, fc_graph, sc_graph, sigmoid=False):
    batch_size = fc_graph["batch_size"]

    # TODO(synk): host-side boolean masks give data-dependent shapes; for a fully
    # jit-able path use static max edge counts + validity masks instead.
    def split_edges(graph):
        mask = np.asarray(graph["edge_mask"])
        neg = np.asarray(graph["neg_mask"])
        remaining_edges = graph["edge_index"][:, mask == 0]
        remaining_attrs = graph["edge_attr"][mask == 0]
        masked_edges = graph["edge_index"][:, mask == 1]
        neg_edges = graph["edge_index"][:, neg == 1]
        return remaining_edges, remaining_attrs, masked_edges, neg_edges

    fc_rem_e, fc_rem_a, fc_masked, fc_neg = split_edges(fc_graph)
    sc_rem_e, sc_rem_a, sc_masked, sc_neg = split_edges(sc_graph)

    fc_z = gnn_encoder_pallas(fc_graph["x"], fc_rem_a, fc_rem_e[0], fc_rem_e[1],
                              params["fc_encoder"])
    sc_z = gnn_encoder_pallas(sc_graph["x"], sc_rem_a, sc_rem_e[0], sc_rem_e[1],
                              params["sc_encoder"])

    # cross_fusion_type == 'attn'
    D = fc_z.shape[-1]
    fc_zb = fc_z.reshape(batch_size, -1, D)
    sc_zb = sc_z.reshape(batch_size, -1, D)
    fc_enh = cross_attention_pallas(fc_zb, sc_zb, params["fc_cross_attn"])
    sc_enh = cross_attention_pallas(sc_zb, fc_zb, params["sc_cross_attn"])
    z_concat = jnp.concatenate([fc_enh, sc_enh], axis=-1)
    z_concat = z_concat.reshape(z_concat.shape[0] * z_concat.shape[1], -1)

    fc_pos_out, fc_neg_out = decode_edges_merged(z_concat, fc_masked, fc_neg,
                                                 params["fc_edge_decoder"], sigmoid)
    sc_pos_out, sc_neg_out = decode_edges_merged(z_concat, sc_masked, sc_neg,
                                                 params["sc_edge_decoder"], sigmoid)

    # deg=False -> degree decoder disabled (matches default constructor)
    return (fc_pos_out, fc_neg_out, None, None, sc_pos_out, sc_neg_out, None, None)


# ----------------------------------------------------------------------------
# Deterministic parameter construction (shapes follow the PyTorch __init__)
# ----------------------------------------------------------------------------
def _dense(key, d_in, d_out, bias=True):
    kw, kb = jax.random.split(key)
    w = jax.random.normal(kw, (d_in, d_out), jnp.float32) * (1.0 / np.sqrt(d_in))
    b = (jax.random.normal(kb, (d_out,), jnp.float32) * 0.05
         if bias else jnp.zeros((d_out,), jnp.float32))
    return w, b


def _conv_params(key, in_node, in_edge, out_node, out_edge):
    ks = jax.random.split(key, 4)
    node_w, _ = _dense(ks[0], in_node, out_node // 2, bias=False)
    edge_w, _ = _dense(ks[1], in_edge, out_edge // 2, bias=False)
    fn_w, fn_b = _dense(ks[2], out_node, out_node)
    fe_w, fe_b = _dense(ks[3], out_edge, out_edge)
    return dict(node_w=node_w, edge_w=edge_w, fn_w=fn_w, fn_b=fn_b, fe_w=fe_w, fe_b=fe_b)


def _bn_params(dim):
    # BatchNorm1d eval mode with default-initialized running statistics.
    return dict(gamma=jnp.ones((dim,), jnp.float32), beta=jnp.zeros((dim,), jnp.float32),
                mean=jnp.zeros((dim,), jnp.float32), var=jnp.ones((dim,), jnp.float32),
                eps=1e-5)


def _encoder_params(key, in_node, in_edge, hidden, out_node, out_edge, num_layers):
    ks = jax.random.split(key, num_layers)
    convs, bns = [], []
    first_out = hidden[0] if num_layers > 1 else out_node
    convs.append(_conv_params(ks[0], in_node, in_edge, first_out, first_out))
    bns.append(_bn_params(first_out))
    for i in range(1, num_layers - 1):
        convs.append(_conv_params(ks[i], hidden[i - 1], hidden[i - 1], hidden[i], hidden[i]))
        bns.append(_bn_params(hidden[i]))
    if num_layers > 1:
        convs.append(_conv_params(ks[-1], hidden[-1], hidden[-1], out_node, out_edge))
        bns.append(_bn_params(out_node))
    return dict(convs=convs, bns=bns)


def _cross_attn_params(key, embed_dim):
    ks = jax.random.split(key, 4)
    wq, bq = _dense(ks[0], embed_dim, embed_dim)
    wk, bk = _dense(ks[1], embed_dim, embed_dim)
    wv, bv = _dense(ks[2], embed_dim, embed_dim)
    wo, bo = _dense(ks[3], embed_dim, embed_dim)
    return dict(wq=wq, bq=bq, wk=wk, bk=bk, wv=wv, bv=bv, wo=wo, bo=bo,
                ln_g=jnp.ones((embed_dim,), jnp.float32),
                ln_b=jnp.zeros((embed_dim,), jnp.float32))


def _edge_decoder_params(key, in_ch, hidden, out_ch, num_layers):
    dims = [in_ch] + list(hidden[: num_layers - 1]) + [out_ch]
    ks = jax.random.split(key, len(dims) - 1)
    ws, bs = [], []
    for i in range(len(dims) - 1):
        w, b = _dense(ks[i], dims[i], dims[i + 1])
        ws.append(w)
        bs.append(b)
    return dict(ws=ws, bs=bs)


def make_maskgae_params(key):
    # encoder_hidden_channels chosen as [16, 16] so encoder_num_layers=3 is consistent.
    ks = jax.random.split(key, 6)
    enc_hidden = [16, 16]
    node_out = 4
    return dict(
        fc_encoder=_encoder_params(ks[0], 16, 1, enc_hidden, node_out, node_out, 3),
        sc_encoder=_encoder_params(ks[1], 3, 3, enc_hidden, node_out, node_out, 3),
        fc_cross_attn=_cross_attn_params(ks[2], node_out),
        sc_cross_attn=_cross_attn_params(ks[3], node_out),
        fc_edge_decoder=_edge_decoder_params(ks[4], node_out * 2, [64, 128, 32], 1, 4),
        sc_edge_decoder=_edge_decoder_params(ks[5], node_out * 2, [64, 128, 32], 1, 4),
    )


# ----------------------------------------------------------------------------
# Main
# ----------------------------------------------------------------------------
if __name__ == "__main__":
    key = jax.random.PRNGKey(0)
    keys = jax.random.split(key, 12)

    batch_size = 2
    nodes_per_graph = 8
    N = batch_size * nodes_per_graph
    E = 32

    def make_graph(kx, ke, ka, node_dim, edge_dim):
        x = jax.random.normal(kx, (N, node_dim), jnp.float32)
        src = jax.random.randint(ke, (E,), 0, N)
        dst = jax.random.randint(ka, (E,), 0, N)
        edge_index = jnp.stack([src, dst]).astype(jnp.int32)
        edge_attr = jax.random.normal(jax.random.fold_in(ka, 7), (E, edge_dim), jnp.float32)
        edge_mask = (jnp.arange(E) % 2).astype(jnp.int32)          # half masked, half remaining
        neg_mask = ((jnp.arange(E) // 2) % 2).astype(jnp.int32)    # deterministic "negatives"
        return dict(batch_size=batch_size, x=x, edge_index=edge_index,
                    edge_attr=edge_attr, edge_mask=edge_mask, neg_mask=neg_mask)

    fc_graph = make_graph(keys[0], keys[1], keys[2], node_dim=16, edge_dim=1)
    sc_graph = make_graph(keys[3], keys[4], keys[5], node_dim=3, edge_dim=3)

    params = make_maskgae_params(keys[6])

    outs = maskgae_stage1_forward(params, fc_graph, sc_graph, sigmoid=False)
    jax.block_until_ready(tuple(o for o in outs if o is not None))

    fc_pos, fc_neg, _, _, sc_pos, sc_neg, _, _ = outs
    assert fc_pos.shape == (int(np.sum(np.asarray(fc_graph["edge_mask"]) == 1)), 1)
    assert fc_neg.shape == (int(np.sum(np.asarray(fc_graph["neg_mask"]) == 1)), 1)
    assert sc_pos.shape == (int(np.sum(np.asarray(sc_graph["edge_mask"]) == 1)), 1)
    assert sc_neg.shape == (int(np.sum(np.asarray(sc_graph["neg_mask"]) == 1)), 1)
    assert bool(jnp.all(jnp.isfinite(fc_pos))) and bool(jnp.all(jnp.isfinite(sc_pos)))
    assert bool(jnp.all(jnp.isfinite(fc_neg))) and bool(jnp.all(jnp.isfinite(sc_neg)))
    print("KERNEL_OK")
</pallas_src>

<mosaic_0001>
module attributes {stable_mosaic.version = 11 : i64} {
  func.func @_gnn_encoder_kernel(%arg0: i32, %arg1: memref<16x16xf32, #tpu.memory_space<vmem>>, %arg2: memref<16x1xf32, #tpu.memory_space<vmem>>, %arg3: memref<16x1xi32, #tpu.memory_space<vmem>>, %arg4: memref<16x1xi32, #tpu.memory_space<vmem>>, %arg5: memref<16x8xbf16, #tpu.memory_space<vmem>>, %arg6: memref<1x8xbf16, #tpu.memory_space<vmem>>, %arg7: memref<8x16xbf16, #tpu.memory_space<vmem>>, %arg8: memref<8x16xbf16, #tpu.memory_space<vmem>>, %arg9: memref<1x16xf32, #tpu.memory_space<vmem>>, %arg10: memref<8x16xbf16, #tpu.memory_space<vmem>>, %arg11: memref<8x16xbf16, #tpu.memory_space<vmem>>, %arg12: memref<1x16xf32, #tpu.memory_space<vmem>>, %arg13: memref<1x16xf32, #tpu.memory_space<vmem>>, %arg14: memref<1x16xf32, #tpu.memory_space<vmem>>, %arg15: memref<16x8xbf16, #tpu.memory_space<vmem>>, %arg16: memref<16x8xbf16, #tpu.memory_space<vmem>>, %arg17: memref<8x16xbf16, #tpu.memory_space<vmem>>, %arg18: memref<8x16xbf16, #tpu.memory_space<vmem>>, %arg19: memref<1x16xf32, #tpu.memory_space<vmem>>, %arg20: memref<8x16xbf16, #tpu.memory_space<vmem>>, %arg21: memref<8x16xbf16, #tpu.memory_space<vmem>>, %arg22: memref<1x16xf32, #tpu.memory_space<vmem>>, %arg23: memref<1x16xf32, #tpu.memory_space<vmem>>, %arg24: memref<1x16xf32, #tpu.memory_space<vmem>>, %arg25: memref<16x2xbf16, #tpu.memory_space<vmem>>, %arg26: memref<16x2xbf16, #tpu.memory_space<vmem>>, %arg27: memref<2x4xbf16, #tpu.memory_space<vmem>>, %arg28: memref<2x4xbf16, #tpu.memory_space<vmem>>, %arg29: memref<1x4xf32, #tpu.memory_space<vmem>>, %arg30: memref<2x4xbf16, #tpu.memory_space<vmem>>, %arg31: memref<2x4xbf16, #tpu.memory_space<vmem>>, %arg32: memref<1x4xf32, #tpu.memory_space<vmem>>, %arg33: memref<1x4xf32, #tpu.memory_space<vmem>>, %arg34: memref<1x4xf32, #tpu.memory_space<vmem>>, %arg35: memref<16x4xf32, #tpu.memory_space<vmem>>) attributes {dimension_semantics = [#tpu.dimension_semantics<arbitrary>], iteration_bounds = array<i64: 1>, scalar_prefetch = 0 : i64, scratch_operands = 0 : i64, tpu.core_type = #tpu.core_type<tc>, window_params = [{pipeline_mode = #tpu.pipeline_mode<synchronous>, transform_indices = @transform_0, window_bounds = array<i64: 16, 16>}, {pipeline_mode = #tpu.pipeline_mode<synchronous>, transform_indices = @transform_1, window_bounds = array<i64: 16, 1>}, {pipeline_mode = #tpu.pipeline_mode<synchronous>, transform_indices = @transform_2, window_bounds = array<i64: 16, 1>}, {pipeline_mode = #tpu.pipeline_mode<synchronous>, transform_indices = @transform_3, window_bounds = array<i64: 16, 1>}, {pipeline_mode = #tpu.pipeline_mode<synchronous>, transform_indices = @transform_4, window_bounds = array<i64: 16, 8>}, {pipeline_mode = #tpu.pipeline_mode<synchronous>, transform_indices = @transform_5, window_bounds = array<i64: 1, 8>}, {pipeline_mode = #tpu.pipeline_mode<synchronous>, transform_indices = @transform_6, window_bounds = array<i64: 8, 16>}, {pipeline_mode = #tpu.pipeline_mode<synchronous>, transform_indices = @transform_7, window_bounds = array<i64: 8, 16>}, {pipeline_mode = #tpu.pipeline_mode<synchronous>, transform_indices = @transform_8, window_bounds = array<i64: 1, 16>}, {pipeline_mode = #tpu.pipeline_mode<synchronous>, transform_indices = @transform_9, window_bounds = array<i64: 8, 16>}, {pipeline_mode = #tpu.pipeline_mode<synchronous>, transform_indices = @transform_10, window_bounds = array<i64: 8, 16>}, {pipeline_mode = #tpu.pipeline_mode<synchronous>, transform_indices = @transform_11, window_bounds = array<i64: 1, 16>}, {pipeline_mode = #tpu.pipeline_mode<synchronous>, transform_indices = @transform_12, window_bounds = array<i64: 1, 16>}, {pipeline_mode = #tpu.pipeline_mode<synchronous>, transform_indices = @transform_13, window_bounds = array<i64: 1, 16>}, {pipeline_mode = #tpu.pipeline_mode<synchronous>, transform_indices = @transform_14, window_bounds = array<i64: 16, 8>}, {pipeline_mode = #tpu.pipeline_mode<synchronous>, transform_indices = @transform_15, window_bounds = array<i64: 16, 8>}, {pipeline_mode = #tpu.pipeline_mode<synchronous>, transform_indices = @transform_16, window_bounds = array<i64: 8, 16>}, {pipeline_mode = #tpu.pipeline_mode<synchronous>, transform_indices = @transform_17, window_bounds = array<i64: 8, 16>}, {pipeline_mode = #tpu.pipeline_mode<synchronous>, transform_indices = @transform_18, window_bounds = array<i64: 1, 16>}, {pipeline_mode = #tpu.pipeline_mode<synchronous>, transform_indices = @transform_19, window_bounds = array<i64: 8, 16>}, {pipeline_mode = #tpu.pipeline_mode<synchronous>, transform_indices = @transform_20, window_bounds = array<i64: 8, 16>}, {pipeline_mode = #tpu.pipeline_mode<synchronous>, transform_indices = @transform_21, window_bounds = array<i64: 1, 16>}, {pipeline_mode = #tpu.pipeline_mode<synchronous>, transform_indices = @transform_22, window_bounds = array<i64: 1, 16>}, {pipeline_mode = #tpu.pipeline_mode<synchronous>, transform_indices = @transform_23, window_bounds = array<i64: 1, 16>}, {pipeline_mode = #tpu.pipeline_mode<synchronous>, transform_indices = @transform_24, window_bounds = array<i64: 16, 2>}, {pipeline_mode = #tpu.pipeline_mode<synchronous>, transform_indices = @transform_25, window_bounds = array<i64: 16, 2>}, {pipeline_mode = #tpu.pipeline_mode<synchronous>, transform_indices = @transform_26, window_bounds = array<i64: 2, 4>}, {pipeline_mode = #tpu.pipeline_mode<synchronous>, transform_indices = @transform_27, window_bounds = array<i64: 2, 4>}, {pipeline_mode = #tpu.pipeline_mode<synchronous>, transform_indices = @transform_28, window_bounds = array<i64: 1, 4>}, {pipeline_mode = #tpu.pipeline_mode<synchronous>, transform_indices = @transform_29, window_bounds = array<i64: 2, 4>}, {pipeline_mode = #tpu.pipeline_mode<synchronous>, transform_indices = @transform_30, window_bounds = array<i64: 2, 4>}, {pipeline_mode = #tpu.pipeline_mode<synchronous>, transform_indices = @transform_31, window_bounds = array<i64: 1, 4>}, {pipeline_mode = #tpu.pipeline_mode<synchronous>, transform_indices = @transform_32, window_bounds = array<i64: 1, 4>}, {pipeline_mode = #tpu.pipeline_mode<synchronous>, transform_indices = @transform_33, window_bounds = array<i64: 1, 4>}, {pipeline_mode = #tpu.pipeline_mode<synchronous>, transform_indices = @transform_34, window_bounds = array<i64: 16, 4>}]} {
    %c0 = arith.constant 0 : index
    %c0_0 = arith.constant 0 : index
    %0 = vector.load %arg1[%c0, %c0_0] : memref<16x16xf32, #tpu.memory_space<vmem>>, vector<16x16xf32>
    %c0_1 = arith.constant 0 : index
    %c0_2 = arith.constant 0 : index
    %1 = vector.load %arg2[%c0_1, %c0_2] : memref<16x1xf32, #tpu.memory_space<vmem>>, vector<16x1xf32>
    %2 = tpu.iota {dimensions = array<i32: 1>} : vector<16x16xi32>
    %c0_3 = arith.constant 0 : index
    %c0_4 = arith.constant 0 : index
    %3 = vector.load %arg3[%c0_3, %c0_4] : memref<16x1xi32, #tpu.memory_space<vmem>>, vector<16x1xi32>
    %4 = vector.broadcast %3 : vector<16x1xi32> to vector<16x16xi32>
    %5 = arith.cmpi eq, %2, %4 : vector<16x16xi32>
    %6 = arith.extui %5 : vector<16x16xi1> to vector<16x16xi32>
    %7 = arith.sitofp %6 : vector<16x16xi32> to vector<16x16xf32>
    %8 = arith.truncf %7 : vector<16x16xf32> to vector<16x16xbf16>
    %c0_5 = arith.constant 0 : index
    %c0_6 = arith.constant 0 : index
    %9 = vector.load %arg4[%c0_5, %c0_6] : memref<16x1xi32, #tpu.memory_space<vmem>>, vector<16x1xi32>
    %10 = vector.broadcast %9 : vector<16x1xi32> to vector<16x16xi32>
    %11 = arith.cmpi eq, %2, %10 : vector<16x16xi32>
    %12 = arith.extui %11 : vector<16x16xi1> to vector<16x16xi32>
    %13 = arith.sitofp %12 : vector<16x16xi32> to vector<16x16xf32>
    %14 = arith.truncf %13 : vector<16x16xf32> to vector<16x16xbf16>
    %c0_7 = arith.constant 0 : index
    %c0_8 = arith.constant 0 : index
    %15 = vector.load %arg5[%c0_7, %c0_8] : memref<16x8xbf16, #tpu.memory_space<vmem>>, vector<16x8xbf16>
    %c0_9 = arith.constant 0 : index
    %c0_10 = arith.constant 0 : index
    %16 = vector.load %arg6[%c0_9, %c0_10] : memref<1x8xbf16, #tpu.memory_space<vmem>>, vector<1x8xbf16>
    %c0_11 = arith.constant 0 : index
    %c0_12 = arith.constant 0 : index
    %17 = vector.load %arg7[%c0_11, %c0_12] : memref<8x16xbf16, #tpu.memory_space<vmem>>, vector<8x16xbf16>
    %c0_13 = arith.constant 0 : index
    %c0_14 = arith.constant 0 : index
    %18 = vector.load %arg8[%c0_13, %c0_14] : memref<8x16xbf16, #tpu.memory_space<vmem>>, vector<8x16xbf16>
    %c0_15 = arith.constant 0 : index
    %c0_16 = arith.constant 0 : index
    %19 = vector.load %arg9[%c0_15, %c0_16] : memref<1x16xf32, #tpu.memory_space<vmem>>, vector<1x16xf32>
    %c0_17 = arith.constant 0 : index
    %c0_18 = arith.constant 0 : index
    %20 = vector.load %arg10[%c0_17, %c0_18] : memref<8x16xbf16, #tpu.memory_space<vmem>>, vector<8x16xbf16>
    %c0_19 = arith.constant 0 : index
    %c0_20 = arith.constant 0 : index
    %21 = vector.load %arg11[%c0_19, %c0_20] : memref<8x16xbf16, #tpu.memory_space<vmem>>, vector<8x16xbf16>
    %c0_21 = arith.constant 0 : index
    %c0_22 = arith.constant 0 : index
    %22 = vector.load %arg12[%c0_21, %c0_22] : memref<1x16xf32, #tpu.memory_space<vmem>>, vector<1x16xf32>
    %c0_23 = arith.constant 0 : index
    %c0_24 = arith.constant 0 : index
    %23 = vector.load %arg13[%c0_23, %c0_24] : memref<1x16xf32, #tpu.memory_space<vmem>>, vector<1x16xf32>
    %c0_25 = arith.constant 0 : index
    %c0_26 = arith.constant 0 : index
    %24 = vector.load %arg14[%c0_25, %c0_26] : memref<1x16xf32, #tpu.memory_space<vmem>>, vector<1x16xf32>
    %25 = arith.truncf %0 : vector<16x16xf32> to vector<16x16xbf16>
    %cst = arith.constant dense<0.000000e+00> : vector<16x8xf32>
    %26 = tpu.matmul %25, %15, %cst {dimension_numbers = #tpu.dot_dimension_numbers<[1], [0], [0], [1], [0, 0, 1, 1], [], []>} : vector<16x16xbf16>, vector<16x8xbf16>, vector<16x8xf32> -> vector<16x8xf32>
    %cst_27 = arith.constant 0.000000e+00 : f32
    %27 = vector.broadcast %cst_27 : f32 to vector<16x8xf32>
    %28 = arith.maximumf %26, %27 : vector<16x8xf32>
    %29 = arith.truncf %1 : vector<16x1xf32> to vector<16x1xbf16>
    %cst_28 = arith.constant dense<0.000000e+00> : vector<16x8xf32>
    %30 = tpu.matmul %29, %16, %cst_28 {dimension_numbers = #tpu.dot_dimension_numbers<[1], [0], [0], [1], [0, 0, 1, 1], [], []>} : vector<16x1xbf16>, vector<1x8xbf16>, vector<16x8xf32> -> vector<16x8xf32>
    %cst_29 = arith.constant 0.000000e+00 : f32
    %31 = vector.broadcast %cst_29 : f32 to vector<16x8xf32>
    %32 = arith.maximumf %30, %31 : vector<16x8xf32>
    %33 = arith.truncf %28 : vector<16x8xf32> to vector<16x8xbf16>
    %34 = arith.truncf %32 : vector<16x8xf32> to vector<16x8xbf16>
    %cst_30 = arith.constant dense<0.000000e+00> : vector<16x8xf32>
    %35 = tpu.matmul %8, %33, %cst_30 {dimension_numbers = #tpu.dot_dimension_numbers<[1], [0], [0], [1], [0, 0, 1, 1], [], []>} : vector<16x16xbf16>, vector<16x8xbf16>, vector<16x8xf32> -> vector<16x8xf32>
    %cst_31 = arith.constant dense<0.000000e+00> : vector<16x8xf32>
    %36 = tpu.matmul %14, %33, %cst_31 {dimension_numbers = #tpu.dot_dimension_numbers<[1], [0], [0], [1], [0, 0, 1, 1], [], []>} : vector<16x16xbf16>, vector<16x8xbf16>, vector<16x8xf32> -> vector<16x8xf32>
    %cst_32 = arith.constant dense<0.000000e+00> : vector<16x8xf32>
    %37 = tpu.matmul %14, %34, %cst_32 {dimension_numbers = #tpu.dot_dimension_numbers<[0], [0], [1], [1], [0, 1, 1, 1], [], []>} : vector<16x16xbf16>, vector<16x8xbf16>, vector<16x8xf32> -> vector<16x8xf32>
    %38 = arith.truncf %37 : vector<16x8xf32> to vector<16x8xbf16>
    %cst_33 = arith.constant dense<0.000000e+00> : vector<16x16xf32>
    %39 = tpu.matmul %38, %17, %cst_33 {dimension_numbers = #tpu.dot_dimension_numbers<[1], [0], [0], [1], [0, 0, 1, 1], [], []>} : vector<16x8xbf16>, vector<8x16xbf16>, vector<16x16xf32> -> vector<16x16xf32>
    %cst_34 = arith.constant dense<0.000000e+00> : vector<16x16xf32>
    %40 = tpu.matmul %33, %18, %cst_34 {dimension_numbers = #tpu.dot_dimension_numbers<[1], [0], [0], [1], [0, 0, 1, 1], [], []>} : vector<16x8xbf16>, vector<8x16xbf16>, vector<16x16xf32> -> vector<16x16xf32>
    %41 = arith.addf %39, %40 : vector<16x16xf32>
    %42 = vector.broadcast %19 : vector<1x16xf32> to vector<16x16xf32>
    %43 = arith.addf %41, %42 : vector<16x16xf32>
    %cst_35 = arith.constant 0.000000e+00 : f32
    %44 = vector.broadcast %cst_35 : f32 to vector<16x16xf32>
    %45 = arith.maximumf %43, %44 : vector<16x16xf32>
    %46 = vector.broadcast %23 : vector<1x16xf32> to vector<16x16xf32>
    %47 = arith.mulf %45, %46 : vector<16x16xf32>
    %48 = vector.broadcast %24 : vector<1x16xf32> to vector<16x16xf32>
    %49 = arith.addf %47, %48 : vector<16x16xf32>
    %50 = arith.addf %35, %36 : vector<16x8xf32>
    %51 = arith.truncf %50 : vector<16x8xf32> to vector<16x8xbf16>
    %cst_36 = arith.constant dense<0.000000e+00> : vector<16x16xf32>
    %52 = tpu.matmul %51, %20, %cst_36 {dimension_numbers = #tpu.dot_dimension_numbers<[1], [0], [0], [1], [0, 0, 1, 1], [], []>} : vector<16x8xbf16>, vector<8x16xbf16>, vector<16x16xf32> -> vector<16x16xf32>
    %cst_37 = arith.constant dense<0.000000e+00> : vector<16x16xf32>
    %53 = tpu.matmul %34, %21, %cst_37 {dimension_numbers = #tpu.dot_dimension_numbers<[1], [0], [0], [1], [0, 0, 1, 1], [], []>} : vector<16x8xbf16>, vector<8x16xbf16>, vector<16x16xf32> -> vector<16x16xf32>
    %54 = arith.addf %52, %53 : vector<16x16xf32>
    %55 = vector.broadcast %22 : vector<1x16xf32> to vector<16x16xf32>
    %56 = arith.addf %54, %55 : vector<16x16xf32>
    %cst_38 = arith.constant 0.000000e+00 : f32
    %57 = vector.broadcast %cst_38 : f32 to vector<16x16xf32>
    %58 = arith.maximumf %56, %57 : vector<16x16xf32>
    %c0_39 = arith.constant 0 : index
    %c0_40 = arith.constant 0 : index
    %59 = vector.load %arg15[%c0_39, %c0_40] : memref<16x8xbf16, #tpu.memory_space<vmem>>, vector<16x8xbf16>
    %c0_41 = arith.constant 0 : index
    %c0_42 = arith.constant 0 : index
    %60 = vector.load %arg16[%c0_41, %c0_42] : memref<16x8xbf16, #tpu.memory_space<vmem>>, vector<16x8xbf16>
    %c0_43 = arith.constant 0 : index
    %c0_44 = arith.constant 0 : index
    %61 = vector.load %arg17[%c0_43, %c0_44] : memref<8x16xbf16, #tpu.memory_space<vmem>>, vector<8x16xbf16>
    %c0_45 = arith.constant 0 : index
    %c0_46 = arith.constant 0 : index
    %62 = vector.load %arg18[%c0_45, %c0_46] : memref<8x16xbf16, #tpu.memory_space<vmem>>, vector<8x16xbf16>
    %c0_47 = arith.constant 0 : index
    %c0_48 = arith.constant 0 : index
    %63 = vector.load %arg19[%c0_47, %c0_48] : memref<1x16xf32, #tpu.memory_space<vmem>>, vector<1x16xf32>
    %c0_49 = arith.constant 0 : index
    %c0_50 = arith.constant 0 : index
    %64 = vector.load %arg20[%c0_49, %c0_50] : memref<8x16xbf16, #tpu.memory_space<vmem>>, vector<8x16xbf16>
    %c0_51 = arith.constant 0 : index
    %c0_52 = arith.constant 0 : index
    %65 = vector.load %arg21[%c0_51, %c0_52] : memref<8x16xbf16, #tpu.memory_space<vmem>>, vector<8x16xbf16>
    %c0_53 = arith.constant 0 : index
    %c0_54 = arith.constant 0 : index
    %66 = vector.load %arg22[%c0_53, %c0_54] : memref<1x16xf32, #tpu.memory_space<vmem>>, vector<1x16xf32>
    %c0_55 = arith.constant 0 : index
    %c0_56 = arith.constant 0 : index
    %67 = vector.load %arg23[%c0_55, %c0_56] : memref<1x16xf32, #tpu.memory_space<vmem>>, vector<1x16xf32>
    %c0_57 = arith.constant 0 : index
    %c0_58 = arith.constant 0 : index
    %68 = vector.load %arg24[%c0_57, %c0_58] : memref<1x16xf32, #tpu.memory_space<vmem>>, vector<1x16xf32>
    %69 = arith.truncf %49 : vector<16x16xf32> to vector<16x16xbf16>
    %cst_59 = arith.constant dense<0.000000e+00> : vector<16x8xf32>
    %70 = tpu.matmul %69, %59, %cst_59 {dimension_numbers = #tpu.dot_dimension_numbers<[1], [0], [0], [1], [0, 0, 1, 1], [], []>} : vector<16x16xbf16>, vector<16x8xbf16>, vector<16x8xf32> -> vector<16x8xf32>
    %cst_60 = arith.constant 0.000000e+00 : f32
    %71 = vector.broadcast %cst_60 : f32 to vector<16x8xf32>
    %72 = arith.maximumf %70, %71 : vector<16x8xf32>
    %73 = arith.truncf %58 : vector<16x16xf32> to vector<16x16xbf16>
    %cst_61 = arith.constant dense<0.000000e+00> : vector<16x8xf32>
    %74 = tpu.matmul %73, %60, %cst_61 {dimension_numbers = #tpu.dot_dimension_numbers<[1], [0], [0], [1], [0, 0, 1, 1], [], []>} : vector<16x16xbf16>, vector<16x8xbf16>, vector<16x8xf32> -> vector<16x8xf32>
    %cst_62 = arith.constant 0.000000e+00 : f32
    %75 = vector.broadcast %cst_62 : f32 to vector<16x8xf32>
    %76 = arith.maximumf %74, %75 : vector<16x8xf32>
    %77 = arith.truncf %72 : vector<16x8xf32> to vector<16x8xbf16>
    %78 = arith.truncf %76 : vector<16x8xf32> to vector<16x8xbf16>
    %cst_63 = arith.constant dense<0.000000e+00> : vector<16x8xf32>
    %79 = tpu.matmul %8, %77, %cst_63 {dimension_numbers = #tpu.dot_dimension_numbers<[1], [0], [0], [1], [0, 0, 1, 1], [], []>} : vector<16x16xbf16>, vector<16x8xbf16>, vector<16x8xf32> -> vector<16x8xf32>
    %cst_64 = arith.constant dense<0.000000e+00> : vector<16x8xf32>
    %80 = tpu.matmul %14, %77, %cst_64 {dimension_numbers = #tpu.dot_dimension_numbers<[1], [0], [0], [1], [0, 0, 1, 1], [], []>} : vector<16x16xbf16>, vector<16x8xbf16>, vector<16x8xf32> -> vector<16x8xf32>
    %cst_65 = arith.constant dense<0.000000e+00> : vector<16x8xf32>
    %81 = tpu.matmul %14, %78, %cst_65 {dimension_numbers = #tpu.dot_dimension_numbers<[0], [0], [1], [1], [0, 1, 1, 1], [], []>} : vector<16x16xbf16>, vector<16x8xbf16>, vector<16x8xf32> -> vector<16x8xf32>
    %82 = arith.truncf %81 : vector<16x8xf32> to vector<16x8xbf16>
    %cst_66 = arith.constant dense<0.000000e+00> : vector<16x16xf32>
    %83 = tpu.matmul %82, %61, %cst_66 {dimension_numbers = #tpu.dot_dimension_numbers<[1], [0], [0], [1], [0, 0, 1, 1], [], []>} : vector<16x8xbf16>, vector<8x16xbf16>, vector<16x16xf32> -> vector<16x16xf32>
    %cst_67 = arith.constant dense<0.000000e+00> : vector<16x16xf32>
    %84 = tpu.matmul %77, %62, %cst_67 {dimension_numbers = #tpu.dot_dimension_numbers<[1], [0], [0], [1], [0, 0, 1, 1], [], []>} : vector<16x8xbf16>, vector<8x16xbf16>, vector<16x16xf32> -> vector<16x16xf32>
    %85 = arith.addf %83, %84 : vector<16x16xf32>
    %86 = vector.broadcast %63 : vector<1x16xf32> to vector<16x16xf32>
    %87 = arith.addf %85, %86 : vector<16x16xf32>
    %cst_68 = arith.constant 0.000000e+00 : f32
    %88 = vector.broadcast %cst_68 : f32 to vector<16x16xf32>
    %89 = arith.maximumf %87, %88 : vector<16x16xf32>
    %90 = vector.broadcast %67 : vector<1x16xf32> to vector<16x16xf32>
    %91 = arith.mulf %89, %90 : vector<16x16xf32>
    %92 = vector.broadcast %68 : vector<1x16xf32> to vector<16x16xf32>
    %93 = arith.addf %91, %92 : vector<16x16xf32>
    %94 = arith.addf %79, %80 : vector<16x8xf32>
    %95 = arith.truncf %94 : vector<16x8xf32> to vector<16x8xbf16>
    %cst_69 = arith.constant dense<0.000000e+00> : vector<16x16xf32>
    %96 = tpu.matmul %95, %64, %cst_69 {dimension_numbers = #tpu.dot_dimension_numbers<[1], [0], [0], [1], [0, 0, 1, 1], [], []>} : vector<16x8xbf16>, vector<8x16xbf16>, vector<16x16xf32> -> vector<16x16xf32>
    %cst_70 = arith.constant dense<0.000000e+00> : vector<16x16xf32>
    %97 = tpu.matmul %78, %65, %cst_70 {dimension_numbers = #tpu.dot_dimension_numbers<[1], [0], [0], [1], [0, 0, 1, 1], [], []>} : vector<16x8xbf16>, vector<8x16xbf16>, vector<16x16xf32> -> vector<16x16xf32>
    %98 = arith.addf %96, %97 : vector<16x16xf32>
    %99 = vector.broadcast %66 : vector<1x16xf32> to vector<16x16xf32>
    %100 = arith.addf %98, %99 : vector<16x16xf32>
    %cst_71 = arith.constant 0.000000e+00 : f32
    %101 = vector.broadcast %cst_71 : f32 to vector<16x16xf32>
    %102 = arith.maximumf %100, %101 : vector<16x16xf32>
    %c0_72 = arith.constant 0 : index
    %c0_73 = arith.constant 0 : index
    %103 = vector.load %arg25[%c0_72, %c0_73] : memref<16x2xbf16, #tpu.memory_space<vmem>>, vector<16x2xbf16>
    %c0_74 = arith.constant 0 : index
    %c0_75 = arith.constant 0 : index
    %104 = vector.load %arg26[%c0_74, %c0_75] : memref<16x2xbf16, #tpu.memory_space<vmem>>, vector<16x2xbf16>
    %c0_76 = arith.constant 0 : index
    %c0_77 = arith.constant 0 : index
    %105 = vector.load %arg27[%c0_76, %c0_77] : memref<2x4xbf16, #tpu.memory_space<vmem>>, vector<2x4xbf16>
    %c0_78 = arith.constant 0 : index
    %c0_79 = arith.constant 0 : index
    %106 = vector.load %arg28[%c0_78, %c0_79] : memref<2x4xbf16, #tpu.memory_space<vmem>>, vector<2x4xbf16>
    %c0_80 = arith.constant 0 : index
    %c0_81 = arith.constant 0 : index
    %107 = vector.load %arg29[%c0_80, %c0_81] : memref<1x4xf32, #tpu.memory_space<vmem>>, vector<1x4xf32>
    %c0_82 = arith.constant 0 : index
    %c0_83 = arith.constant 0 : index
    %108 = vector.load %arg33[%c0_82, %c0_83] : memref<1x4xf32, #tpu.memory_space<vmem>>, vector<1x4xf32>
    %c0_84 = arith.constant 0 : index
    %c0_85 = arith.constant 0 : index
    %109 = vector.load %arg34[%c0_84, %c0_85] : memref<1x4xf32, #tpu.memory_space<vmem>>, vector<1x4xf32>
    %110 = arith.truncf %93 : vector<16x16xf32> to vector<16x16xbf16>
    %cst_86 = arith.constant dense<0.000000e+00> : vector<16x2xf32>
    %111 = tpu.matmul %110, %103, %cst_86 {dimension_numbers = #tpu.dot_dimension_numbers<[1], [0], [0], [1], [0, 0, 1, 1], [], []>} : vector<16x16xbf16>, vector<16x2xbf16>, vector<16x2xf32> -> vector<16x2xf32>
    %cst_87 = arith.constant 0.000000e+00 : f32
    %112 = vector.broadcast %cst_87 : f32 to vector<16x2xf32>
    %113 = arith.maximumf %111, %112 : vector<16x2xf32>
    %114 = arith.truncf %102 : vector<16x16xf32> to vector<16x16xbf16>
    %cst_88 = arith.constant dense<0.000000e+00> : vector<16x2xf32>
    %115 = tpu.matmul %114, %104, %cst_88 {dimension_numbers = #tpu.dot_dimension_numbers<[1], [0], [0], [1], [0, 0, 1, 1], [], []>} : vector<16x16xbf16>, vector<16x2xbf16>, vector<16x2xf32> -> vector<16x2xf32>
    %cst_89 = arith.constant 0.000000e+00 : f32
    %116 = vector.broadcast %cst_89 : f32 to vector<16x2xf32>
    %117 = arith.maximumf %115, %116 : vector<16x2xf32>
    %118 = arith.truncf %113 : vector<16x2xf32> to vector<16x2xbf16>
    %119 = arith.truncf %117 : vector<16x2xf32> to vector<16x2xbf16>
    %cst_90 = arith.constant dense<0.000000e+00> : vector<16x2xf32>
    %120 = tpu.matmul %14, %119, %cst_90 {dimension_numbers = #tpu.dot_dimension_numbers<[0], [0], [1], [1], [0, 1, 1, 1], [], []>} : vector<16x16xbf16>, vector<16x2xbf16>, vector<16x2xf32> -> vector<16x2xf32>
    %121 = arith.truncf %120 : vector<16x2xf32> to vector<16x2xbf16>
    %cst_91 = arith.constant dense<0.000000e+00> : vector<16x4xf32>
    %122 = tpu.matmul %121, %105, %cst_91 {dimension_numbers = #tpu.dot_dimension_numbers<[1], [0], [0], [1], [0, 0, 1, 1], [], []>} : vector<16x2xbf16>, vector<2x4xbf16>, vector<16x4xf32> -> vector<16x4xf32>
    %cst_92 = arith.constant dense<0.000000e+00> : vector<16x4xf32>
    %123 = tpu.matmul %118, %106, %cst_92 {dimension_numbers = #tpu.dot_dimension_numbers<[1], [0], [0], [1], [0, 0, 1, 1], [], []>} : vector<16x2xbf16>, vector<2x4xbf16>, vector<16x4xf32> -> vector<16x4xf32>
    %124 = arith.addf %122, %123 : vector<16x4xf32>
    %125 = vector.broadcast %107 : vector<1x4xf32> to vector<16x4xf32>
    %126 = arith.addf %124, %125 : vector<16x4xf32>
    %cst_93 = arith.constant 0.000000e+00 : f32
    %127 = vector.broadcast %cst_93 : f32 to vector<16x4xf32>
    %128 = arith.maximumf %126, %127 : vector<16x4xf32>
    %129 = vector.broadcast %108 : vector<1x4xf32> to vector<16x4xf32>
    %130 = arith.mulf %128, %129 : vector<16x4xf32>
    %131 = vector.broadcast %109 : vector<1x4xf32> to vector<16x4xf32>
    %132 = arith.addf %130, %131 : vector<16x4xf32>
    %c0_94 = arith.constant 0 : index
    %c0_95 = arith.constant 0 : index
    %133 = vector.load %arg35[%c0_94, %c0_95] : memref<16x4xf32, #tpu.memory_space<vmem>>, vector<16x4xf32>
    tpu.vector_store %arg35[%c0_94, %c0_95], %132 {strides = array<i32>} : memref<16x4xf32, #tpu.memory_space<vmem>>, vector<16x4xf32>,
    return
  }
  func.func @transform_0(%arg0: i32) -> (i32, i32) {
    %c0_i32 = arith.constant 0 : i32
    %c0_i32_0 = arith.constant 0 : i32
    %c0_i32_1 = arith.constant 0 : i32
    return %c0_i32, %c0_i32_0 : i32, i32
  }
  func.func @transform_1(%arg0: i32) -> (i32, i32) {
    %c0_i32 = arith.constant 0 : i32
    %c0_i32_0 = arith.constant 0 : i32
    %c0_i32_1 = arith.constant 0 : i32
    return %c0_i32, %c0_i32_0 : i32, i32
  }
  func.func @transform_2(%arg0: i32) -> (i32, i32) {
    %c0_i32 = arith.constant 0 : i32
    %c0_i32_0 = arith.constant 0 : i32
    %c0_i32_1 = arith.constant 0 : i32
    return %c0_i32, %c0_i32_0 : i32, i32
  }
  func.func @transform_3(%arg0: i32) -> (i32, i32) {
    %c0_i32 = arith.constant 0 : i32
    %c0_i32_0 = arith.constant 0 : i32
    %c0_i32_1 = arith.constant 0 : i32
    return %c0_i32, %c0_i32_0 : i32, i32
  }
  func.func @transform_4(%arg0: i32) -> (i32, i32) {
    %c0_i32 = arith.constant 0 : i32
    %c0_i32_0 = arith.constant 0 : i32
    %c0_i32_1 = arith.constant 0 : i32
    return %c0_i32, %c0_i32_0 : i32, i32
  }
  func.func @transform_5(%arg0: i32) -> (i32, i32) {
    %c0_i32 = arith.constant 0 : i32
    %c0_i32_0 = arith.constant 0 : i32
    %c0_i32_1 = arith.constant 0 : i32
    return %c0_i32, %c0_i32_0 : i32, i32
  }
  func.func @transform_6(%arg0: i32) -> (i32, i32) {
    %c0_i32 = arith.constant 0 : i32
    %c0_i32_0 = arith.constant 0 : i32
    %c0_i32_1 = arith.constant 0 : i32
    return %c0_i32, %c0_i32_0 : i32, i32
  }
  func.func @transform_7(%arg0: i32) -> (i32, i32) {
    %c0_i32 = arith.constant 0 : i32
    %c0_i32_0 = arith.constant 0 : i32
    %c0_i32_1 = arith.constant 0 : i32
    return %c0_i32, %c0_i32_0 : i32, i32
  }
  func.func @transform_8(%arg0: i32) -> (i32, i32) {
    %c0_i32 = arith.constant 0 : i32
    %c0_i32_0 = arith.constant 0 : i32
    %c0_i32_1 = arith.constant 0 : i32
    return %c0_i32, %c0_i32_0 : i32, i32
  }
  func.func @transform_9(%arg0: i32) -> (i32, i32) {
    %c0_i32 = arith.constant 0 : i32
    %c0_i32_0 = arith.constant 0 : i32
    %c0_i32_1 = arith.constant 0 : i32
    return %c0_i32, %c0_i32_0 : i32, i32
  }
  func.func @transform_10(%arg0: i32) -> (i32, i32) {
    %c0_i32 = arith.constant 0 : i32
    %c0_i32_0 = arith.constant 0 : i32
    %c0_i32_1 = arith.constant 0 : i32
    return %c0_i32, %c0_i32_0 : i32, i32
  }
  func.func @transform_11(%arg0: i32) -> (i32, i32) {
    %c0_i32 = arith.constant 0 : i32
    %c0_i32_0 = arith.constant 0 : i32
    %c0_i32_1 = arith.constant 0 : i32
    return %c0_i32, %c0_i32_0 : i32, i32
  }
  func.func @transform_12(%arg0: i32) -> (i32, i32) {
    %c0_i32 = arith.constant 0 : i32
    %c0_i32_0 = arith.constant 0 : i32
    %c0_i32_1 = arith.constant 0 : i32
    return %c0_i32, %c0_i32_0 : i32, i32
  }
  func.func @transform_13(%arg0: i32) -> (i32, i32) {
    %c0_i32 = arith.constant 0 : i32
    %c0_i32_0 = arith.constant 0 : i32
    %c0_i32_1 = arith.constant 0 : i32
    return %c0_i32, %c0_i32_0 : i32, i32
  }
  func.func @transform_14(%arg0: i32) -> (i32, i32) {
    %c0_i32 = arith.constant 0 : i32
    %c0_i32_0 = arith.constant 0 : i32
    %c0_i32_1 = arith.constant 0 : i32
    return %c0_i32, %c0_i32_0 : i32, i32
  }
  func.func @transform_15(%arg0: i32) -> (i32, i32) {
    %c0_i32 = arith.constant 0 : i32
    %c0_i32_0 = arith.constant 0 : i32
    %c0_i32_1 = arith.constant 0 : i32
    return %c0_i32, %c0_i32_0 : i32, i32
  }
  func.func @transform_16(%arg0: i32) -> (i32, i32) {
    %c0_i32 = arith.constant 0 : i32
    %c0_i32_0 = arith.constant 0 : i32
    %c0_i32_1 = arith.constant 0 : i32
    return %c0_i32, %c0_i32_0 : i32, i32
  }
  func.func @transform_17(%arg0: i32) -> (i32, i32) {
    %c0_i32 = arith.constant 0 : i32
    %c0_i32_0 = arith.constant 0 : i32
    %c0_i32_1 = arith.constant 0 : i32
    return %c0_i32, %c0_i32_0 : i32, i32
  }
  func.func @transform_18(%arg0: i32) -> (i32, i32) {
    %c0_i32 = arith.constant 0 : i32
    %c0_i32_0 = arith.constant 0 : i32
    %c0_i32_1 = arith.constant 0 : i32
    return %c0_i32, %c0_i32_0 : i32, i32
  }
  func.func @transform_19(%arg0: i32) -> (i32, i32) {
    %c0_i32 = arith.constant 0 : i32
    %c0_i32_0 = arith.constant 0 : i32
    %c0_i32_1 = arith.constant 0 : i32
    return %c0_i32, %c0_i32_0 : i32, i32
  }
  func.func @transform_20(%arg0: i32) -> (i32, i32) {
    %c0_i32 = arith.constant 0 : i32
    %c0_i32_0 = arith.constant 0 : i32
    %c0_i32_1 = arith.constant 0 : i32
    return %c0_i32, %c0_i32_0 : i32, i32
  }
  func.func @transform_21(%arg0: i32) -> (i32, i32) {
    %c0_i32 = arith.constant 0 : i32
    %c0_i32_0 = arith.constant 0 : i32
    %c0_i32_1 = arith.constant 0 : i32
    return %c0_i32, %c0_i32_0 : i32, i32
  }
  func.func @transform_22(%arg0: i32) -> (i32, i32) {
    %c0_i32 = arith.constant 0 : i32
    %c0_i32_0 = arith.constant 0 : i32
    %c0_i32_1 = arith.constant 0 : i32
    return %c0_i32, %c0_i32_0 : i32, i32
  }
  func.func @transform_23(%arg0: i32) -> (i32, i32) {
    %c0_i32 = arith.constant 0 : i32
    %c0_i32_0 = arith.constant 0 : i32
    %c0_i32_1 = arith.constant 0 : i32
    return %c0_i32, %c0_i32_0 : i32, i32
  }
  func.func @transform_24(%arg0: i32) -> (i32, i32) {
    %c0_i32 = arith.constant 0 : i32
    %c0_i32_0 = arith.constant 0 : i32
    %c0_i32_1 = arith.constant 0 : i32
    return %c0_i32, %c0_i32_0 : i32, i32
  }
  func.func @transform_25(%arg0: i32) -> (i32, i32) {
    %c0_i32 = arith.constant 0 : i32
    %c0_i32_0 = arith.constant 0 : i32
    %c0_i32_1 = arith.constant 0 : i32
    return %c0_i32, %c0_i32_0 : i32, i32
  }
  func.func @transform_26(%arg0: i32) -> (i32, i32) {
    %c0_i32 = arith.constant 0 : i32
    %c0_i32_0 = arith.constant 0 : i32
    %c0_i32_1 = arith.constant 0 : i32
    return %c0_i32, %c0_i32_0 : i32, i32
  }
  func.func @transform_27(%arg0: i32) -> (i32, i32) {
    %c0_i32 = arith.constant 0 : i32
    %c0_i32_0 = arith.constant 0 : i32
    %c0_i32_1 = arith.constant 0 : i32
    return %c0_i32, %c0_i32_0 : i32, i32
  }
  func.func @transform_28(%arg0: i32) -> (i32, i32) {
    %c0_i32 = arith.constant 0 : i32
    %c0_i32_0 = arith.constant 0 : i32
    %c0_i32_1 = arith.constant 0 : i32
    return %c0_i32, %c0_i32_0 : i32, i32
  }
  func.func @transform_29(%arg0: i32) -> (i32, i32) {
    %c0_i32 = arith.constant 0 : i32
    %c0_i32_0 = arith.constant 0 : i32
    %c0_i32_1 = arith.constant 0 : i32
    return %c0_i32, %c0_i32_0 : i32, i32
  }
  func.func @transform_30(%arg0: i32) -> (i32, i32) {
    %c0_i32 = arith.constant 0 : i32
    %c0_i32_0 = arith.constant 0 : i32
    %c0_i32_1 = arith.constant 0 : i32
    return %c0_i32, %c0_i32_0 : i32, i32
  }
  func.func @transform_31(%arg0: i32) -> (i32, i32) {
    %c0_i32 = arith.constant 0 : i32
    %c0_i32_0 = arith.constant 0 : i32
    %c0_i32_1 = arith.constant 0 : i32
    return %c0_i32, %c0_i32_0 : i32, i32
  }
  func.func @transform_32(%arg0: i32) -> (i32, i32) {
    %c0_i32 = arith.constant 0 : i32
    %c0_i32_0 = arith.constant 0 : i32
    %c0_i32_1 = arith.constant 0 : i32
    return %c0_i32, %c0_i32_0 : i32, i32
  }
  func.func @transform_33(%arg0: i32) -> (i32, i32) {
    %c0_i32 = arith.constant 0 : i32
    %c0_i32_0 = arith.constant 0 : i32
    %c0_i32_1 = arith.constant 0 : i32
    return %c0_i32, %c0_i32_0 : i32, i32
  }
  func.func @transform_34(%arg0: i32) -> (i32, i32) {
    %c0_i32 = arith.constant 0 : i32
    %c0_i32_0 = arith.constant 0 : i32
    %c0_i32_1 = arith.constant 0 : i32
    return %c0_i32, %c0_i32_0 : i32, i32
  }
}

</mosaic_0001>

<bundles_post_ra>
// kernel: tpu_custom_call.1
= control target key start
LH: loop header
LB: loop body
LE: loop exit
PB: predicated region body
PF: predicated region fallthrough
CT: control target
= control target key end

     0   :  { %v1739_v0 = vmov 0   ;;  %s1740_s3 = smov 3   ;;  %v1741_v1 = vmov 0.0   ;;  %s1742_s7 = smov 4   ;;  %vm1743_vm0 = vmmov 0   ;;  %vm249_vm1 = vcmask 1040384   ;;  %s1994_s0 = inlined_call_operand.smem [shape: u32[35], index: -1, kind: input, shape index: {}] }
   0x1   :  { %1732 = vset.pattern.permute.xlu0 %v1739_v0  ;;  %s1434_s6 = sld [smem:[%s1994_s0 + %s1740_s3]]   ;;  %1552 = vmatprep.subr.bf16.mxu0 %v1741_v1  ;;  %s1744_s14 = smov 5   ;;  %v251_v3 = vsel %vm249_vm1, 65535, %v1739_v0  ;;  %vm197_vm2 = vcmask 130048   ;;  %vm245_vm3 = vcmask 7168   ;;  %v147_v16 = vlaneseq }
   0x2   :  { %s1435_s10 = sld [smem:[%s1994_s0 + %s1742_s7]]   ;;  %1554 = vmatprep.mubr.msk.bf16.mxu0 %vm1743_vm0, %v1741_v1  ;;  %1558 = vmatprep.subr.bf16.mxu1 %v1741_v1  ;;  %s1745_s18 = smov 1   ;;  %vm409_vm6 = vcmask 1043456   ;;  %vm405_vm7 = vcmask 64512   ;;  %vm1304_vm10 = vcmask 15360   ;;  %vm1425_vm11 = vcmask 31744  }
   0x3   :  { %s1_s13 = sld [smem:[%s1994_s0]]   ;;  %1560 = vmatprep.mubr.msk.bf16.mxu1 %vm1743_vm0, %v1741_v1  ;;  %1733 = vset.pattern.permute.xlu1 %v1739_v0  ;;  %s1746_s22 = smov 2   ;;  %v148_v17 = vand.u32 127, %v147_v16 }
   0x4   :  { %s1436_s17 = sld [smem:[%s1994_s0 + %s1744_s14]]   ;;  %s1747_s26 = smov 7  }
   0x5   :  { %s1432_s21 = sld [smem:[%s1994_s0 + %s1745_s18]]   ;;  %s1748_s30 = smov 6  }
   0x6   :  { %s1433_s25 = sld [smem:[%s1994_s0 + %s1746_s22]]   ;;  %s1749_s4 = smov 9  }
   0x7   :  { %v164_v2 = vld [vmem:[%s1434_s6] sm:$0xff]  ;;  %v165_v6 = vld [vmem:[%s1434_s6 + $0x8] sm:$0xff]  ;;  %s1438_s29 = sld [smem:[%s1994_s0 + %s1747_s26]]   ;;  %s1750_s8 = smov 10  }
   0x8   :  { %167 = vperm.xlu0 %1732, %v164_v2   ;;  %v1734_v4 = vld [vmem:[%s1435_s10] sm:$0xff]   ;;  %s1437_s3 = sld [smem:[%s1994_s0 + %s1748_s30]]   ;;  %s1751_s12 = smov 14  }
   0x9   :  { %v143_v5 = vld [vmem:[%s1_s13] sm:$0xff]  ;;  %v144_v7 = vld [vmem:[%s1_s13 + $0x8] sm:$0xff]  ;;  %1553 = vmatpush3.bf16.msra.mxu0 %v1734_v4  ;;  %s1440_s7 = sld [smem:[%s1994_s0 + %s1749_s4]]   ;;  %s1752_s16 = smov 15  }
   0xa   :  { %v181_v8 = vld [vmem:[%s1436_s17] sm:$0x1]  ;;  %v190_v9 = vpack.c.bf16 %v144_v7, %v143_v5  ;;  %1564 = vmatprep.subr.bf16.mxu0 %v1741_v1  ;;  %s1441_s11 = sld [smem:[%s1994_s0 + %s1750_s8]]   ;;  %s1753_s20 = smov 8  }
   0xb   :  { %v253_v10 = vand.u32 %v251_v3, %v181_v8  ;;  %v145_v11 = vld [vmem:[%s1432_s21] sm:$0xff]  ;;  %v146_v12 = vld [vmem:[%s1432_s21 + $0x8] sm:$0xff]  ;;  %s1445_s15 = sld [smem:[%s1994_s0 + %s1751_s12]]   ;;  %s1754_s24 = smov 12  }
   0xc   :  { %v244_v13 = vpack.c.bf16 %v146_v12, %v145_v11  ;;  %v149_v14 = vld [vmem:[%s1433_s25] sm:$0xff]  ;;  %170 = vperm.xlu0 %1732, %v165_v6   ;;  %1555 = vmatmul.mubr.msk.bf16.vlgmr.msra.gmra.mrb[0].mxu0 %vm197_vm2, %v190_v9  ;;  %v150_v15 = vld [vmem:[%s1433_s25 + $0x8] sm:$0xff]  ;;  %s1446_s19 = sld [smem:[%s1994_s0 + %s1752_s16]]   ;;  %s1755_s28 = smov 13  }
   0xd   :  { %1559 = vmatpush3.bf16.msra.mxu1 %v253_v10  ;;  %152 = vperm.xlu1 %1733, %v149_v14   ;;  %v183_v36 = vld [vmem:[%s1438_s29] sm:$0xf]  ;;  %s1439_s23 = sld [smem:[%s1994_s0 + %s1753_s20]]   ;;  %s1756_s2 = smov 11  }
   0xe   :  { %1566 = vmatprep.mubr.msk.bf16.mxu0 %vm1743_vm0, %v1741_v1  ;;  %1570 = vmatprep.subr.bf16.mxu1 %v1741_v1  ;;  %v411_v39 = vsel %vm409_vm6, %v183_v36, 0  ;;  %v182_v45 = vld [vmem:[%s1437_s3] sm:$0xf]  ;;  %s1443_s27 = sld [smem:[%s1994_s0 + %s1754_s24]]   ;;  %s1757_s6 = smov 17  }
   0xf   :  { %v458_v46 = vsel %vm409_vm6, %v182_v45, 0  ;;  %v185_v47 = vld [vmem:[%s1440_s7] sm:$0xf]  ;;  %s1444_s1 = sld [smem:[%s1994_s0 + %s1755_s28]]   ;;  %s1758_s10 = smov 16  }
  0x10   :  { %1561 = vmatmul.mubr.msk.bf16.vlgmr.msra.gmra.mrb[0].mxu1 %vm245_vm3, %v244_v13  ;;  %v623_v48 = vsel %vm409_vm6, %v185_v47, 0  ;;  %v186_v54 = vld [vmem:[%s1441_s11] sm:$0xf]  ;;  %s1442_s5 = sld [smem:[%s1994_s0 + %s1756_s2]]   ;;  %s1759_s14 = smov 19  }
  0x11   :  { %1572 = vmatprep.mubr.msk.bf16.mxu1 %vm1743_vm0, %v1741_v1  ;;  %155 = vperm.xlu1 %1733, %v150_v15   ;;  %v576_v60 = vsel %vm409_vm6, %v186_v54, 0  ;;  %v1735_v2 = vld [vmem:[%s1445_s15] sm:$0xff]   ;;  %s1448_s9 = sld [smem:[%s1994_s0 + %s1757_s6]]   ;;  %s1760_s18 = smov 20  }
  0x12   :  { %v1736_v3 = vld [vmem:[%s1446_s19] sm:$0xff]   ;;  %s1447_s13 = sld [smem:[%s1994_s0 + %s1758_s10]]   ;;  %s1761_s22 = smov 24  }
  0x13   :  { %v1474_v4 = vld [vmem:[%s1439_s23] ss:$0 sm:$0xff]  ;;  %s1450_s17 = sld [smem:[%s1994_s0 + %s1759_s14]]   ;;  %s1762_s26 = smov 25  }
  0x14   :  { %v1475_v13 = vld [vmem:[%s1443_s27] ss:$0 sm:$0xff]  ;;  %s1451_s21 = sld [smem:[%s1994_s0 + %s1760_s18]]   ;;  %s1763_s30 = smov 18  }
  0x15   :  { %s1455_s25 = sld [smem:[%s1994_s0 + %s1761_s22]]   ;;  %s1764_s4 = smov 22  }
  0x16   :  { %s1456_s29 = sld [smem:[%s1994_s0 + %s1762_s26]]   ;;  %s1765_s8 = smov 23  }
  0x17   :  { %s1449_s3 = sld [smem:[%s1994_s0 + %s1763_s30]]   ;;  %s1766_s12 = smov 21  }
  0x18   :  { %s1453_s7 = sld [smem:[%s1994_s0 + %s1764_s4]]   ;;  %s1767_s16 = smov 27  }
  0x19   :  { %s1454_s11 = sld [smem:[%s1994_s0 + %s1765_s8]]   ;;  %s1768_s20 = smov 26  }
  0x1a   :  { %s1452_s15 = sld [smem:[%s1994_s0 + %s1766_s12]]   ;;  %s1769_s24 = smov 28  }
  0x1b   :  { %s1458_s19 = sld [smem:[%s1994_s0 + %s1767_s16]]   ;;  %s1770_s28 = smov 32  }
  0x1c   :  { %s1457_s23 = sld [smem:[%s1994_s0 + %s1768_s20]]   ;;  %s1771_s2 = smov 33  }
  0x1d   :  { %s1459_s27 = sld [smem:[%s1994_s0 + %s1769_s24]]   ;;  %s1772_s6 = smov 34  }
  0x87   :  { %v168_v18 = vpop.permute.xlu0 %167 }
  0x88   :  { %vm172_vm4 = vcmp.eq.s32.totalorder %v148_v17, %v168_v18 }
  0x89   :  { %v1465_v20 = vsel %vm172_vm4, 1.0, %v1741_v1 }
  0x8b   :  { %v171_v19 = vpop.permute.xlu0 %170 }
  0x8c   :  { %vm173_vm5 = vcmp.eq.s32.totalorder %v148_v17, %v171_v19  ;;  %v153_v38 = vpop.permute.xlu1 %152 }
  0x8d   :  { %v1466_v21 = vsel %vm173_vm5, 1.0, %v1741_v1  ;;  %vm157_vm8 = vcmp.eq.s32.totalorder %v148_v17, %v153_v38 }
  0x8e   :  { %v1812_v22 = vpack.c.bf16 %v1466_v21, %v1465_v20  ;;  %v1463_v41 = vsel %vm157_vm8, 1.0, %v1741_v1  ;;  %v1476_v21 = vld [vmem:[%s1444_s1] ss:$0 sm:$0xff]  ;;  %s1460_s1 = sld [smem:[%s1994_s0 + %s1770_s28]]  }
  0x90   :  { %344 = vxpose.xlu0.c.b16.start.end [1/1] (short) (narrow) %v1812_v22, 16  ;;  %v156_v40 = vpop.permute.xlu1 %155 }
  0x91   :  { %vm158_vm9 = vcmp.eq.s32.totalorder %v148_v17, %v156_v40 }
  0x92   :  { %v1464_v42 = vsel %vm158_vm9, 1.0, %v1741_v1 }
  0x93   :  { %v1832_v43 = vpack.c.bf16 %v1464_v42, %v1463_v41 }
  0xdf   :  { %v235_v23 = vpop.f32.mrb[0].mxu0 }
  0xe0   :  { %v242_v24 = vmax.f32 %v235_v23, 0.0  ;;  %v1556_v25 = vpop.f32.mrb[1].mxu0  ;;  %v1480_v23 = vld [vmem:[%s1442_s5] ss:$0 sm:$0xff]  ;;  %s1461_s5 = sld [smem:[%s1994_s0 + %s1771_s2]]  }
  0xe1   :  { %v238_v26 = vpop.f32.mrb[2].mxu0 }
  0xe2   :  { %v243_v28 = vmax.f32 %v238_v26, 0.0  ;;  %v1557_v29 = vpop.f32.mrb[3].mxu0 }
  0xe3   :  { %v289_v27 = vpop.f32.mrb[0].mxu1 }
  0xe4   :  { %v296_v30 = vmax.f32 %v289_v27, 0.0  ;;  %v1562_v31 = vpop.f32.mrb[1].mxu1  ;;  %v298_v33 = vpack.c.bf16 %v243_v28, %v242_v24 }
  0xe5   :  { %v292_v32 = vpop.f32.mrb[2].mxu1 }
  0xe6   :  { %v297_v34 = vmax.f32 %v292_v32, 0.0  ;;  %v1563_v35 = vpop.f32.mrb[3].mxu1  ;;  %1565 = vmatpush3.bf16.msra.mxu0 %v298_v33 }
  0xe7   :  { %1576 = vmatprep.subr.bf16.mxu0 %v1741_v1 }
  0xe8   :  { %v299_v37 = vpack.c.bf16 %v297_v34, %v296_v30 }
  0xe9   :  { %1567 = vmatmul.mubr.msk.bf16.vlgmr.msra.gmra.mrb[4].mxu0 %vm197_vm2, %v1812_v22 }
  0xea   :  { %1571 = vmatpush3.bf16.msra.mxu1 %v299_v37  ;;  %1577 = vmatpush3.bf16.msra.mxu0 %v411_v39 }
  0xeb   :  { %1582 = vmatprep.subr.bf16.mxu1 %v1741_v1  ;;  %1578 = vmatprep.mubr.msk.bf16.mxu0 %vm1743_vm0, %v1741_v1 }
  0xec   :  { %1588 = vmatprep.subr.bf16.mxu0 %v1741_v1 }
  0xf1   :  { %1579 = vmatmul.mubr.msk.bf16.vlgmr.msra.gmra.mrb[8].mxu0 %vm405_vm7, %v298_v33 }
  0xf2   :  { %1589 = vmatpush3.bf16.msra.mxu0 %v298_v33  ;;  %1590 = vmatprep.mubr.msk.bf16.mxu0 %vm1743_vm0, %v1741_v1 }
  0xf3   :  { %1600 = vmatprep.subr.bf16.mxu0 %v1741_v1 }
  0xf6   :  { %v1834_v44 = vpop.trf.xlu0 }
  0xf7   :  { %1573 = vmatmul.mubr.msk.bf16.vlgmr.msra.gmra.mrb[4].mxu1 %vm197_vm2, %v1834_v44 }
  0xf8   :  { %1584 = vmatprep.mubr.msk.bf16.mxu1 %vm1743_vm0, %v1741_v1  ;;  %1583 = vmatpush3.bf16.msra.mxu1 %v458_v46 }
  0xf9   :  { %1591 = vmatmul.mubr.msk.bf16.vlgmr.msra.gmra.mrb[4].mxu0 %vm197_vm2, %v1832_v43  ;;  %1594 = vmatprep.subr.bf16.mxu1 %v1741_v1 }
  0xfa   :  { %1602 = vmatprep.mubr.msk.bf16.mxu0 %vm1743_vm0, %v1741_v1  ;;  %1601 = vmatpush3.bf16.msra.mxu0 %v623_v48 }
  0xfb   :  { %1612 = vmatprep.subr.bf16.mxu0 %v1741_v1 }
 0x1c4   :  { %v447_v49 = vpop.f32.mrb[8].mxu0 }
 0x1c5   :  { %v1580_v50 = vpop.f32.mrb[9].mxu0 }
 0x1c6   :  { %v450_v51 = vpop.f32.mrb[10].mxu0  ;;  %v681_v50 = vld [vmem:[%s1448_s9] sm:$0xf]  ;;  %s1462_s9 = sld [smem:[%s1994_s0 + %s1772_s6]]  }
 0x1c7   :  { %v1581_v52 = vpop.f32.mrb[11].mxu0 }
 0x1ca   :  { %v397_v53 = vpop.f32.mrb[4].mxu1 }
 0x1cb   :  { %v1574_v55 = vpop.f32.mrb[5].mxu1 }
 0x1cc   :  { %v400_v56 = vpop.f32.mrb[6].mxu1  ;;  %v564_v59 = vpop.f32.mrb[4].mxu0  ;;  %v883_v55 = vsel %vm409_vm6, %v681_v50, 0 }
 0x1cd   :  { %v404_v57 = vpack.c.bf16 %v400_v56, %v397_v53  ;;  %v1575_v58 = vpop.f32.mrb[7].mxu1  ;;  %v1592_v61 = vpop.f32.mrb[5].mxu0 }
 0x1ce   :  { %v567_v62 = vpop.f32.mrb[6].mxu0 }
 0x1cf   :  { %1585 = vmatmul.mubr.msk.bf16.vlgmr.msra.gmra.mrb[8].mxu1 %vm405_vm7, %v404_v57  ;;  %v571_v63 = vpack.c.bf16 %v567_v62, %v564_v59  ;;  %v1593_v0 = vpop.f32.mrb[7].mxu0 }
 0x1d0   :  { %1595 = vmatpush3.bf16.msra.mxu1 %v576_v60  ;;  %1596 = vmatprep.mubr.msk.bf16.mxu1 %vm1743_vm0, %v1741_v1  ;;  %v684_v60 = vld [vmem:[%s1451_s21] sm:$0xf] }
 0x1d1   :  { %1606 = vmatprep.subr.bf16.mxu1 %v1741_v1  ;;  %1603 = vmatmul.mubr.msk.bf16.vlgmr.msra.gmra.mrb[12].mxu0 %vm405_vm7, %v571_v63 }
 0x1d2   :  { %1614 = vmatprep.mubr.msk.bf16.mxu0 %vm1743_vm0, %v1741_v1  ;;  %1613 = vmatpush3.bf16.msra.mxu0 %v1736_v3 }
 0x1d3   :  { %1624 = vmatprep.subr.bf16.mxu0 %v1741_v1 }
 0x1d7   :  { %1597 = vmatmul.mubr.msk.bf16.vlgmr.msra.gmra.mrb[12].mxu1 %vm405_vm7, %v299_v37 }
 0x1d8   :  { %1608 = vmatprep.mubr.msk.bf16.mxu1 %vm1743_vm0, %v1741_v1  ;;  %1607 = vmatpush3.bf16.msra.mxu1 %v1735_v2  ;;  %v1045_v2 = vsel %vm409_vm6, %v684_v60, 0 }
 0x1d9   :  { %1618 = vmatprep.subr.bf16.mxu1 %v1741_v1 }
 0x2a2   :  { %v494_v5 = vpop.f32.mrb[8].mxu1 }
 0x2a3   :  { %v495_v6 = vadd.f32 %v494_v5, %v447_v49  ;;  %v1586_v7 = vpop.f32.mrb[9].mxu1 }
 0x2a4   :  { %v497_v8 = vpop.f32.mrb[10].mxu1  ;;  %v659_v12 = vpop.f32.mrb[12].mxu0 }
 0x2a5   :  { %v507_v9 = vadd.f32 %v1474_v4, %v495_v6  ;;  %v498_v10 = vadd.f32 %v497_v8, %v450_v51  ;;  %v1587_v11 = vpop.f32.mrb[11].mxu1  ;;  %v1604_v14 = vpop.f32.mrb[13].mxu0 }
 0x2a6   :  { %v662_v17 = vpop.f32.mrb[14].mxu0  ;;  %v1489_v14 = vld [vmem:[%s1449_s3] ss:$0 sm:$0xff] }
 0x2a7   :  { %v509_v15 = vmax.f32 %v507_v9, 0.0  ;;  %v508_v16 = vadd.f32 %v1474_v4, %v498_v10  ;;  %v1605_v18 = vpop.f32.mrb[15].mxu0 }
 0x2a9   :  { %v517_v19 = vmul.f32 %v1475_v13, %v509_v15  ;;  %v510_v20 = vmax.f32 %v508_v16, 0.0 }
 0x2aa   :  { %v612_v24 = vpop.f32.mrb[12].mxu1 }
 0x2ab   :  { %v518_v25 = vmul.f32 %v1475_v13, %v510_v20  ;;  %v660_v26 = vadd.f32 %v659_v12, %v612_v24  ;;  %v1598_v27 = vpop.f32.mrb[13].mxu1  ;;  %v525_v29 = vadd.f32 %v1476_v21, %v517_v19  ;;  %v1737_v12 = vld [vmem:[%s1455_s25] sm:$0xff]  }
 0x2ac   :  { %v615_v28 = vpop.f32.mrb[14].mxu1  ;;  %v1738_v13 = vld [vmem:[%s1456_s29] sm:$0xff]  }
 0x2ad   :  { %v526_v30 = vadd.f32 %v1476_v21, %v518_v25  ;;  %v672_v31 = vadd.f32 %v1480_v23, %v660_v26  ;;  %v663_v32 = vadd.f32 %v662_v17, %v615_v28  ;;  %v1599_v33 = vpop.f32.mrb[15].mxu1  ;;  %v1491_v28 = vld [vmem:[%s1454_s11] ss:$0 sm:$0xff] }
 0x2af   :  { %v688_v34 = vpack.c.bf16 %v526_v30, %v525_v29  ;;  %v673_v35 = vadd.f32 %v1480_v23, %v663_v32  ;;  %v674_v36 = vmax.f32 %v672_v31, 0.0  ;;  %v1490_v23 = vld [vmem:[%s1453_s7] ss:$0 sm:$0xff] }
 0x2b1   :  { %v675_v37 = vmax.f32 %v673_v35, 0.0  ;;  %1609 = vmatmul.mubr.msk.bf16.vlgmr.msra.gmra.mrb[16].mxu1 %vm197_vm2, %v688_v34 }
 0x2b2   :  { %1620 = vmatprep.mubr.msk.bf16.mxu1 %vm1743_vm0, %v1741_v1 }
 0x2b3   :  { %v741_v38 = vpack.c.bf16 %v675_v37, %v674_v36  ;;  %v1495_v36 = vld [vmem:[%s1452_s15] ss:$0 sm:$0xff] }
 0x2b5   :  { %1615 = vmatmul.mubr.msk.bf16.vlgmr.msra.gmra.mrb[16].mxu0 %vm197_vm2, %v741_v38 }
 0x2b6   :  { %1626 = vmatprep.mubr.msk.bf16.mxu0 %vm1743_vm0, %v1741_v1 }
 0x384   :  { %v732_v39 = vpop.f32.mrb[16].mxu1 }
 0x385   :  { %v1610_v40 = vpop.f32.mrb[17].mxu1  ;;  %v739_v42 = vmax.f32 %v732_v39, 0.0 }
 0x386   :  { %v735_v41 = vpop.f32.mrb[18].mxu1 }
 0x387   :  { %v740_v45 = vmax.f32 %v735_v41, 0.0  ;;  %v1611_v46 = vpop.f32.mrb[19].mxu1 }
 0x388   :  { %v785_v47 = vpop.f32.mrb[16].mxu0 }
 0x389   :  { %v794_v48 = vpack.c.bf16 %v740_v45, %v739_v42  ;;  %v1616_v49 = vpop.f32.mrb[17].mxu0  ;;  %v792_v52 = vmax.f32 %v785_v47, 0.0 }
 0x38a   :  { %v788_v51 = vpop.f32.mrb[18].mxu0 }
 0x38b   :  { %v793_v53 = vmax.f32 %v788_v51, 0.0  ;;  %v1617_v54 = vpop.f32.mrb[19].mxu0  ;;  %1619 = vmatpush3.bf16.msra.mxu1 %v794_v48  ;;  %v1150_v51 = vld [vmem:[%s1458_s19] sm:$0x1] }
 0x38c   :  { %1630 = vmatprep.subr.bf16.mxu1 %v1741_v1 }
 0x38d   :  { %v795_v56 = vpack.c.bf16 %v793_v53, %v792_v52  ;;  %v1309_v52 = vsel %vm249_vm1, %v1150_v51, 0 }
 0x38e   :  { %1621 = vmatmul.mubr.msk.bf16.vlgmr.msra.gmra.mrb[20].mxu1 %vm197_vm2, %v1812_v22  ;;  %v680_v22 = vld [vmem:[%s1447_s13] sm:$0xf] }
 0x38f   :  { %1625 = vmatpush3.bf16.msra.mxu0 %v795_v56  ;;  %1631 = vmatpush3.bf16.msra.mxu1 %v883_v55  ;;  %v930_v57 = vsel %vm409_vm6, %v680_v22, 0 }
 0x390   :  { %1632 = vmatprep.mubr.msk.bf16.mxu1 %vm1743_vm0, %v1741_v1  ;;  %1642 = vmatprep.subr.bf16.mxu1 %v1741_v1 }
 0x391   :  { %1636 = vmatprep.subr.bf16.mxu0 %v1741_v1 }
 0x392   :  { %1627 = vmatmul.mubr.msk.bf16.vlgmr.msra.gmra.mrb[20].mxu0 %vm197_vm2, %v1834_v44 }
 0x393   :  { %1638 = vmatprep.mubr.msk.bf16.mxu0 %vm1743_vm0, %v1741_v1  ;;  %1637 = vmatpush3.bf16.msra.mxu0 %v930_v57 }
 0x394   :  { %1648 = vmatprep.subr.bf16.mxu0 %v1741_v1 }
 0x396   :  { %1633 = vmatmul.mubr.msk.bf16.vlgmr.msra.gmra.mrb[24].mxu1 %vm405_vm7, %v794_v48 }
 0x397   :  { %1643 = vmatpush3.bf16.msra.mxu1 %v794_v48  ;;  %1644 = vmatprep.mubr.msk.bf16.mxu1 %vm1743_vm0, %v1741_v1 }
 0x398   :  { %1654 = vmatprep.subr.bf16.mxu1 %v1741_v1 }
 0x39e   :  { %1645 = vmatmul.mubr.msk.bf16.vlgmr.msra.gmra.mrb[20].mxu1 %vm197_vm2, %v1832_v43  ;;  %v683_v43 = vld [vmem:[%s1450_s17] sm:$0xf] }
 0x39f   :  { %1656 = vmatprep.mubr.msk.bf16.mxu1 %vm1743_vm0, %v1741_v1  ;;  %v1092_v58 = vsel %vm409_vm6, %v683_v43, 0 }
 0x3a0   :  { %1655 = vmatpush3.bf16.msra.mxu1 %v1092_v58 }
 0x3a1   :  { %1666 = vmatprep.subr.bf16.mxu1 %v1741_v1 }
 0x465   :  { %v871_v59 = vpop.f32.mrb[20].mxu0 }
 0x466   :  { %v1628_v61 = vpop.f32.mrb[21].mxu0 }
 0x467   :  { %v874_v62 = vpop.f32.mrb[22].mxu0 }
 0x468   :  { %v878_v63 = vpack.c.bf16 %v874_v62, %v871_v59  ;;  %v1629_v0 = vpop.f32.mrb[23].mxu0 }
 0x469   :  { %v919_v3 = vpop.f32.mrb[24].mxu1 }
 0x46a   :  { %v1634_v4 = vpop.f32.mrb[25].mxu1  ;;  %1639 = vmatmul.mubr.msk.bf16.vlgmr.msra.gmra.mrb[24].mxu0 %vm405_vm7, %v878_v63 }
 0x46b   :  { %v922_v5 = vpop.f32.mrb[26].mxu1  ;;  %1649 = vmatpush3.bf16.msra.mxu0 %v1045_v2  ;;  %1650 = vmatprep.mubr.msk.bf16.mxu0 %vm1743_vm0, %v1741_v1  ;;  %v1149_v2 = vld [vmem:[%s1457_s23] sm:$0x1] }
 0x46c   :  { %v1635_v6 = vpop.f32.mrb[27].mxu1  ;;  %1660 = vmatprep.subr.bf16.mxu0 %v1741_v1 }
 0x471   :  { %v1033_v7 = vpop.f32.mrb[20].mxu1 }
 0x472   :  { %v1646_v8 = vpop.f32.mrb[21].mxu1  ;;  %1651 = vmatmul.mubr.msk.bf16.vlgmr.msra.gmra.mrb[28].mxu0 %vm405_vm7, %v795_v56 }
 0x473   :  { %v1036_v9 = vpop.f32.mrb[22].mxu1  ;;  %1662 = vmatprep.mubr.msk.bf16.mxu0 %vm1743_vm0, %v1741_v1  ;;  %1661 = vmatpush3.bf16.msra.mxu0 %v1737_v12 }
 0x474   :  { %v1040_v10 = vpack.c.bf16 %v1036_v9, %v1033_v7  ;;  %v1647_v11 = vpop.f32.mrb[23].mxu1  ;;  %1672 = vmatprep.subr.bf16.mxu0 %v1741_v1 }
 0x476   :  { %1657 = vmatmul.mubr.msk.bf16.vlgmr.msra.gmra.mrb[28].mxu1 %vm405_vm7, %v1040_v10 }
 0x477   :  { %1668 = vmatprep.mubr.msk.bf16.mxu1 %vm1743_vm0, %v1741_v1  ;;  %1667 = vmatpush3.bf16.msra.mxu1 %v1738_v13 }
 0x478   :  { %1678 = vmatprep.subr.bf16.mxu1 %v1741_v1 }
 0x53d   :  { %v966_v15 = vpop.f32.mrb[24].mxu0 }
 0x53e   :  { %v967_v16 = vadd.f32 %v966_v15, %v919_v3  ;;  %v1640_v17 = vpop.f32.mrb[25].mxu0  ;;  %v1356_v3 = vsel %vm249_vm1, %v1149_v2, 0 }
 0x53f   :  { %v969_v18 = vpop.f32.mrb[26].mxu0 }
 0x540   :  { %v979_v19 = vadd.f32 %v1489_v14, %v967_v16  ;;  %v970_v20 = vadd.f32 %v969_v18, %v922_v5  ;;  %v1641_v21 = vpop.f32.mrb[27].mxu0 }
 0x542   :  { %v981_v24 = vmax.f32 %v979_v19, 0.0  ;;  %v980_v25 = vadd.f32 %v1489_v14, %v970_v20  ;;  %v1504_v19 = vld [vmem:[%s1460_s1] ss:$0 sm:$0xff] }
 0x544   :  { %v989_v26 = vmul.f32 %v1490_v23, %v981_v24  ;;  %v982_v27 = vmax.f32 %v980_v25, 0.0 }
 0x545   :  { %v1081_v29 = vpop.f32.mrb[28].mxu0 }
 0x546   :  { %v990_v30 = vmul.f32 %v1490_v23, %v982_v27  ;;  %v1652_v31 = vpop.f32.mrb[29].mxu0  ;;  %v997_v33 = vadd.f32 %v1491_v28, %v989_v26  ;;  %v1505_v23 = vld [vmem:[%s1461_s5] ss:$0 sm:$0xff] }
 0x547   :  { %v1084_v32 = vpop.f32.mrb[30].mxu0 }
 0x548   :  { %v998_v34 = vadd.f32 %v1491_v28, %v990_v30  ;;  %v1653_v35 = vpop.f32.mrb[31].mxu0 }
 0x549   :  { %v1128_v37 = vpop.f32.mrb[28].mxu1 }
 0x54a   :  { %v1154_v38 = vpack.c.bf16 %v998_v34, %v997_v33  ;;  %v1129_v39 = vadd.f32 %v1128_v37, %v1081_v29  ;;  %v1658_v40 = vpop.f32.mrb[29].mxu1 }
 0x54b   :  { %v1131_v41 = vpop.f32.mrb[30].mxu1 }
 0x54c   :  { %v1141_v42 = vadd.f32 %v1495_v36, %v1129_v39  ;;  %v1132_v45 = vadd.f32 %v1131_v41, %v1084_v32  ;;  %v1659_v46 = vpop.f32.mrb[31].mxu1  ;;  %1663 = vmatmul.mubr.msk.bf16.vlgmr.msra.gmra.mrb[32].mxu0 %vm197_vm2, %v1154_v38 }
 0x54d   :  { %1674 = vmatprep.mubr.msk.bf16.mxu0 %vm1743_vm0, %v1741_v1 }
 0x54e   :  { %v1142_v47 = vadd.f32 %v1495_v36, %v1132_v45  ;;  %v1143_v48 = vmax.f32 %v1141_v42, 0.0 }
 0x550   :  { %v1144_v49 = vmax.f32 %v1142_v47, 0.0 }
 0x552   :  { %v1207_v50 = vpack.c.bf16 %v1144_v49, %v1143_v48 }
 0x554   :  { %1669 = vmatmul.mubr.msk.bf16.vlgmr.msra.gmra.mrb[32].mxu1 %vm197_vm2, %v1207_v50 }
 0x555   :  { %1680 = vmatprep.mubr.msk.bf16.mxu1 %vm1743_vm0, %v1741_v1  ;;  %1679 = vmatpush3.bf16.msra.mxu1 %v1309_v52 }
 0x61f   :  { %v1198_v53 = vpop.f32.mrb[32].mxu0 }
 0x620   :  { %v1664_v54 = vpop.f32.mrb[33].mxu0  ;;  %v1205_v56 = vmax.f32 %v1198_v53, 0.0 }
 0x621   :  { %v1201_v55 = vpop.f32.mrb[34].mxu0 }
 0x622   :  { %v1206_v22 = vmax.f32 %v1201_v55, 0.0  ;;  %v1665_v57 = vpop.f32.mrb[35].mxu0 }
 0x624   :  { %v1260_v43 = vpack.c.bf16 %v1206_v22, %v1205_v56 }
 0x626   :  { %1681 = vmatmul.mubr.msk.bf16.vlgmr.msra.gmra.mrb[36].mxu1 %vm1304_vm10, %v1260_v43 }
 0x627   :  { %v1251_v58 = vpop.f32.mrb[32].mxu1 }
 0x628   :  { %v1670_v59 = vpop.f32.mrb[33].mxu1  ;;  %v1258_v61 = vmax.f32 %v1251_v58, 0.0 }
 0x629   :  { %v1254_v60 = vpop.f32.mrb[34].mxu1 }
 0x62a   :  { %v1259_v62 = vmax.f32 %v1254_v60, 0.0  ;;  %v1671_v63 = vpop.f32.mrb[35].mxu1 }
 0x62c   :  { %v1261_v0 = vpack.c.bf16 %v1259_v62, %v1258_v61 }
 0x62e   :  { %1673 = vmatpush3.bf16.msra.mxu0 %v1261_v0 }
 0x62f   :  { %1684 = vmatprep.subr.bf16.mxu0 %v1741_v1 }
 0x631   :  { %1675 = vmatmul.mubr.msk.bf16.vlgmr.msra.gmra.mrb[36].mxu0 %vm197_vm2, %v1834_v44 }
 0x632   :  { %1686 = vmatprep.mubr.msk.bf16.mxu0 %vm1743_vm0, %v1741_v1  ;;  %1685 = vmatpush3.bf16.msra.mxu0 %v1356_v3  ;;  %v1503_v1 = vld [vmem:[%s1459_s27] ss:$0 sm:$0xff] }
 0x6f9   :  { %v1345_v4 = vpop.f32.mrb[36].mxu1 }
 0x6fa   :  { %v1682_v5 = vpop.f32.mrb[37].mxu1 }
 0x6fb   :  { %v1348_v6 = vpop.f32.mrb[38].mxu1 }
 0x6fc   :  { %v1683_v7 = vpop.f32.mrb[39].mxu1 }
 0x704   :  { %v1296_v8 = vpop.f32.mrb[36].mxu0 }
 0x705   :  { %v1676_v9 = vpop.f32.mrb[37].mxu0 }
 0x706   :  { %v1299_v10 = vpop.f32.mrb[38].mxu0 }
 0x707   :  { %v1303_v44 = vpack.c.bf16 %v1299_v10, %v1296_v8  ;;  %v1677_v11 = vpop.f32.mrb[39].mxu0 }
 0x709   :  { %1687 = vmatmul.mubr.msk.bf16.vlgmr.msra.gmra.mrb[40].mxu0 %vm1304_vm10, %v1303_v44 }
 0x7dc   :  { %v1392_v12 = vpop.f32.mrb[40].mxu0 }
 0x7dd   :  { %v1393_v13 = vadd.f32 %v1392_v12, %v1345_v4  ;;  %v1688_v14 = vpop.f32.mrb[41].mxu0 }
 0x7de   :  { %v1395_v15 = vpop.f32.mrb[42].mxu0 }
 0x7df   :  { %v1405_v16 = vadd.f32 %v1503_v1, %v1393_v13  ;;  %v1396_v17 = vadd.f32 %v1395_v15, %v1348_v6  ;;  %v1689_v18 = vpop.f32.mrb[43].mxu0 }
 0x7e1   :  { %v1407_v20 = vmax.f32 %v1405_v16, 0.0  ;;  %v1406_v21 = vadd.f32 %v1503_v1, %v1396_v17 }
 0x7e3   :  { %v1415_v24 = vmul.f32 %v1504_v19, %v1407_v20  ;;  %v1408_v25 = vmax.f32 %v1406_v21, 0.0 }
 0x7e5   :  { %v1423_v26 = vadd.f32 %v1505_v23, %v1415_v24  ;;  %v1416_v27 = vmul.f32 %v1504_v19, %v1408_v25 }
 0x7e7   :  { %1426 = vst.msk [vmem:[%s1462_s9] sm:$0xff] %vm1425_vm11, %v1423_v26  ;;  %v1424_v28 = vadd.f32 %v1505_v23, %v1416_v27 }
 0x7e9   :  { %1427 = vst.msk [vmem:[%s1462_s9 + $0x8] sm:$0xff] %vm1425_vm11, %v1424_v28 }

</bundles_post_ra>
